<compile_context>
chip_gen: v7x
topology: tpu7x:2x2x1
jax: 0.10.0
libtpu: 0.0.40
codegen_flags: <defaults>
</compile_context>

<pallas_src>
import jax
import jax.numpy as jnp
from jax import lax
from jax.experimental import pallas as pl
from jax.experimental.pallas import tpu as pltpu

EPS = 1e-5


def add_layernorm_kernel(x_ref, y_ref, g_ref, b_ref, o_ref):
    # x_ref, y_ref, o_ref: (block_rows, H); g_ref, b_ref: (1, H)
    s = x_ref[...] + y_ref[...]
    if s.dtype != jnp.float32:
        s = s.astype(jnp.float32)

    # Two-pass (PyTorch-exact, biased) statistics. The second elementwise pass
    # and extra XLU reduce have large slack under the HBM DMA (max-not-sum),
    # and this avoids the E[s^2] - mean^2 cancellation issue when |mean| >> std.
    mean = jnp.mean(s, axis=-1, keepdims=True)
    centered = s - mean
    var = jnp.mean(centered * centered, axis=-1, keepdims=True)
    inv = lax.rsqrt(var + EPS)  # EUP — effectively free

    g = g_ref[...]
    b = b_ref[...]
    if g.dtype != jnp.float32:
        g = g.astype(jnp.float32)
    if b.dtype != jnp.float32:
        b = b.astype(jnp.float32)

    o_ref[...] = (centered * inv * g + b).astype(o_ref.dtype)


def _choose_block_rows(rows, *, target=96, cap=1024):
    """Pick the row-block size.

    ~96-128 rows is the sweet spot (review): 3-4 blocks at the 384x768 spec
    shape for v5e overlap, an even split across v7x's two TensorCores, and a
    block never larger than `cap` rows (~3 MiB/array) so it stays VMEM-safe.
    Always a multiple of 8; at least 2 blocks whenever the row count allows it.
    """
    half = 8 * pl.cdiv(pl.cdiv(rows, 2), 8)  # ceil(rows/2), rounded up to 8
    return max(8, min(target, half, cap))


def add_layernorm(x146, x112, gamma, beta, *, out_dtype=None, row_block=96,
                  alias_input=True, prefer_core_parallel=True):
    assert x146.shape == x112.shape
    B, S, H = x146.shape
    R = B * S
    out_dtype = x146.dtype if out_dtype is None else jnp.dtype(out_dtype)

    x2d = x146.reshape(R, H)
    y2d = x112.reshape(R, H)
    g2d = gamma.reshape(1, H)
    b2d = beta.reshape(1, H)

    block_rows = _choose_block_rows(R, target=row_block)
    n_blocks = pl.cdiv(R, block_rows)
    r_pad = block_rows * n_blocks
    if r_pad != R:
        pad = ((0, r_pad - R), (0, 0))
        x2d = jnp.pad(x2d, pad)
        y2d = jnp.pad(y2d, pad)

    # Reuse x's HBM buffer for the output (same shape/dtype): saves an HBM
    # allocation, and is truly in-place when the caller donates x146.
    aliases = {0: 0} if (alias_input and x2d.dtype == out_dtype) else {}

    blk = pl.BlockSpec((block_rows, H), lambda i: (i, 0))
    vec = pl.BlockSpec((1, H), lambda i: (0, 0))

    def run(semantics):
        return pl.pallas_call(
            add_layernorm_kernel,
            out_shape=jax.ShapeDtypeStruct((r_pad, H), out_dtype),
            grid_spec=pltpu.PrefetchScalarGridSpec(
                num_scalar_prefetch=0,
                grid=(n_blocks,),
                in_specs=[blk, blk, vec, vec],
                out_specs=blk,
            ),
            input_output_aliases=aliases,
            compiler_params=pltpu.CompilerParams(
                dimension_semantics=(semantics,)),
        )(x2d, y2d, g2d, b2d)

    out2d = None
    core_parallel = getattr(pltpu, "CORE_PARALLEL", None)
    if prefer_core_parallel and core_parallel is not None:
        # Explicit cross-TensorCore sharding of the row-block axis (v7x has
        # 2 TCs). Guarded: fall back to plain "parallel" if this chip /
        # toolchain rejects it.
        try:
            out2d = jax.block_until_ready(run(core_parallel))
        except Exception:
            out2d = None
    if out2d is None:
        out2d = run(getattr(pltpu, "PARALLEL", "parallel"))

    if r_pad != R:
        out2d = out2d[:R]
    return out2d.reshape(B, S, H)


if __name__ == "__main__":
    # Shapes from the module spec: (1, 384, 768); H fixed by LayerNorm((768,)).
    B, S, H = 1, 384, 768
    key = jax.random.PRNGKey(0)
    k1, k2 = jax.random.split(key)
    x146 = jax.random.normal(k1, (B, S, H), dtype=jnp.float32)
    x112 = jax.random.normal(k2, (B, S, H), dtype=jnp.float32)

    # PyTorch LayerNorm(elementwise_affine=True) default init: weight=1, bias=0
    gamma = jnp.ones((H,), dtype=jnp.float32)
    beta = jnp.zeros((H,), dtype=jnp.float32)

    out = add_layernorm(x146, x112, gamma, beta)
    out = jax.block_until_ready(out)

    # Reference: PyTorch LayerNorm semantics (biased variance, eps inside rsqrt).
    s = x146 + x112
    mean = jnp.mean(s, axis=-1, keepdims=True)
    var = jnp.mean((s - mean) ** 2, axis=-1, keepdims=True)
    ref = (s - mean) * lax.rsqrt(var + EPS) * gamma + beta
    err = float(jnp.max(jnp.abs(out - ref)))
    assert err < 1e-4, f"max abs err {err}"

    print("KERNEL_OK")
</pallas_src>

<mosaic_0001>
module attributes {stable_mosaic.version = 11 : i64} {
  func.func @add_layernorm_kernel(%arg0: i32, %arg1: memref<96x768xf32, #tpu.memory_space<vmem>>, %arg2: memref<96x768xf32, #tpu.memory_space<vmem>>, %arg3: memref<1x768xf32, #tpu.memory_space<vmem>>, %arg4: memref<1x768xf32, #tpu.memory_space<vmem>>, %arg5: memref<96x768xf32, #tpu.memory_space<vmem>>) attributes {dimension_semantics = [#tpu.dimension_semantics<core_parallel>], iteration_bounds = array<i64: 4>, scalar_prefetch = 0 : i64, scratch_operands = 0 : i64, tpu.core_type = #tpu.core_type<tc>, window_params = [{transform_indices = @transform_0, window_bounds = array<i64: 96, 768>}, {transform_indices = @transform_1, window_bounds = array<i64: 96, 768>}, {pipeline_mode = #tpu.pipeline_mode<synchronous>, transform_indices = @transform_2, window_bounds = array<i64: 1, 768>}, {pipeline_mode = #tpu.pipeline_mode<synchronous>, transform_indices = @transform_3, window_bounds = array<i64: 1, 768>}, {transform_indices = @transform_4, window_bounds = array<i64: 96, 768>}]} {
    %c0 = arith.constant 0 : index
    %c0_0 = arith.constant 0 : index
    %0 = vector.load %arg1[%c0, %c0_0] : memref<96x768xf32, #tpu.memory_space<vmem>>, vector<96x768xf32>
    %c0_1 = arith.constant 0 : index
    %c0_2 = arith.constant 0 : index
    %1 = vector.load %arg2[%c0_1, %c0_2] : memref<96x768xf32, #tpu.memory_space<vmem>>, vector<96x768xf32>
    %2 = arith.addf %0, %1 : vector<96x768xf32>
    %cst = arith.constant dense<0.000000e+00> : vector<96xf32>
    %3 = vector.multi_reduction <add>, %2, %cst [1] : vector<96x768xf32> to vector<96xf32>
    %4 = vector.shape_cast %3 : vector<96xf32> to vector<96x1xf32>
    %cst_3 = arith.constant 7.680000e+02 : f32
    %5 = vector.broadcast %cst_3 : f32 to vector<96x1xf32>
    %6 = arith.divf %4, %5 : vector<96x1xf32>
    %7 = vector.broadcast %6 : vector<96x1xf32> to vector<96x768xf32>
    %8 = arith.subf %2, %7 : vector<96x768xf32>
    %9 = arith.mulf %8, %8 : vector<96x768xf32>
    %cst_4 = arith.constant dense<0.000000e+00> : vector<96xf32>
    %10 = vector.multi_reduction <add>, %9, %cst_4 [1] : vector<96x768xf32> to vector<96xf32>
    %11 = vector.shape_cast %10 : vector<96xf32> to vector<96x1xf32>
    %cst_5 = arith.constant 7.680000e+02 : f32
    %12 = vector.broadcast %cst_5 : f32 to vector<96x1xf32>
    %13 = arith.divf %11, %12 : vector<96x1xf32>
    %cst_6 = arith.constant 9.99999974E-6 : f32
    %14 = vector.broadcast %cst_6 : f32 to vector<96x1xf32>
    %15 = arith.addf %13, %14 : vector<96x1xf32>
    %16 = math.rsqrt %15 : vector<96x1xf32>
    %c0_7 = arith.constant 0 : index
    %c0_8 = arith.constant 0 : index
    %17 = vector.load %arg3[%c0_7, %c0_8] : memref<1x768xf32, #tpu.memory_space<vmem>>, vector<1x768xf32>
    %c0_9 = arith.constant 0 : index
    %c0_10 = arith.constant 0 : index
    %18 = vector.load %arg4[%c0_9, %c0_10] : memref<1x768xf32, #tpu.memory_space<vmem>>, vector<1x768xf32>
    %19 = vector.broadcast %16 : vector<96x1xf32> to vector<96x768xf32>
    %20 = arith.mulf %8, %19 : vector<96x768xf32>
    %21 = vector.broadcast %17 : vector<1x768xf32> to vector<96x768xf32>
    %22 = arith.mulf %20, %21 : vector<96x768xf32>
    %23 = vector.broadcast %18 : vector<1x768xf32> to vector<96x768xf32>
    %24 = arith.addf %22, %23 : vector<96x768xf32>
    %c0_11 = arith.constant 0 : index
    %c0_12 = arith.constant 0 : index
    %25 = vector.load %arg5[%c0_11, %c0_12] : memref<96x768xf32, #tpu.memory_space<vmem>>, vector<96x768xf32>
    tpu.vector_store %arg5[%c0_11, %c0_12], %24 {strides = array<i32>} : memref<96x768xf32, #tpu.memory_space<vmem>>, vector<96x768xf32>,
    return
  }
  func.func @transform_0(%arg0: i32) -> (i32, i32) {
    %c0_i32 = arith.constant 0 : i32
    %c0_i32_0 = arith.constant 0 : i32
    return %arg0, %c0_i32 : i32, i32
  }
  func.func @transform_1(%arg0: i32) -> (i32, i32) {
    %c0_i32 = arith.constant 0 : i32
    %c0_i32_0 = arith.constant 0 : i32
    return %arg0, %c0_i32 : i32, i32
  }
  func.func @transform_2(%arg0: i32) -> (i32, i32) {
    %c0_i32 = arith.constant 0 : i32
    %c0_i32_0 = arith.constant 0 : i32
    %c0_i32_1 = arith.constant 0 : i32
    return %c0_i32, %c0_i32_0 : i32, i32
  }
  func.func @transform_3(%arg0: i32) -> (i32, i32) {
    %c0_i32 = arith.constant 0 : i32
    %c0_i32_0 = arith.constant 0 : i32
    %c0_i32_1 = arith.constant 0 : i32
    return %c0_i32, %c0_i32_0 : i32, i32
  }
  func.func @transform_4(%arg0: i32) -> (i32, i32) {
    %c0_i32 = arith.constant 0 : i32
    %c0_i32_0 = arith.constant 0 : i32
    return %arg0, %c0_i32 : i32, i32
  }
}

module attributes {stable_mosaic.version = 11 : i64} {
  func.func @add_layernorm_kernel(%arg0: i32, %arg1: memref<96x768xf32, #tpu.memory_space<vmem>>, %arg2: memref<96x768xf32, #tpu.memory_space<vmem>>, %arg3: memref<1x768xf32, #tpu.memory_space<vmem>>, %arg4: memref<1x768xf32, #tpu.memory_space<vmem>>, %arg5: memref<96x768xf32, #tpu.memory_space<vmem>>) attributes {dimension_semantics = [#tpu.dimension_semantics<parallel>], iteration_bounds = array<i64: 4>, scalar_prefetch = 0 : i64, scratch_operands = 0 : i64, tpu.core_type = #tpu.core_type<tc>, window_params = [{transform_indices = @transform_0, window_bounds = array<i64: 96, 768>}, {transform_indices = @transform_1, window_bounds = array<i64: 96, 768>}, {pipeline_mode = #tpu.pipeline_mode<synchronous>, transform_indices = @transform_2, window_bounds = array<i64: 1, 768>}, {pipeline_mode = #tpu.pipeline_mode<synchronous>, transform_indices = @transform_3, window_bounds = array<i64: 1, 768>}, {transform_indices = @transform_4, window_bounds = array<i64: 96, 768>}]} {
    %c0 = arith.constant 0 : index
    %c0_0 = arith.constant 0 : index
    %0 = vector.load %arg1[%c0, %c0_0] : memref<96x768xf32, #tpu.memory_space<vmem>>, vector<96x768xf32>
    %c0_1 = arith.constant 0 : index
    %c0_2 = arith.constant 0 : index
    %1 = vector.load %arg2[%c0_1, %c0_2] : memref<96x768xf32, #tpu.memory_space<vmem>>, vector<96x768xf32>
    %2 = arith.addf %0, %1 : vector<96x768xf32>
    %cst = arith.constant dense<0.000000e+00> : vector<96xf32>
    %3 = vector.multi_reduction <add>, %2, %cst [1] : vector<96x768xf32> to vector<96xf32>
    %4 = vector.shape_cast %3 : vector<96xf32> to vector<96x1xf32>
    %cst_3 = arith.constant 7.680000e+02 : f32
    %5 = vector.broadcast %cst_3 : f32 to vector<96x1xf32>
    %6 = arith.divf %4, %5 : vector<96x1xf32>
    %7 = vector.broadcast %6 : vector<96x1xf32> to vector<96x768xf32>
    %8 = arith.subf %2, %7 : vector<96x768xf32>
    %9 = arith.mulf %8, %8 : vector<96x768xf32>
    %cst_4 = arith.constant dense<0.000000e+00> : vector<96xf32>
    %10 = vector.multi_reduction <add>, %9, %cst_4 [1] : vector<96x768xf32> to vector<96xf32>
    %11 = vector.shape_cast %10 : vector<96xf32> to vector<96x1xf32>
    %cst_5 = arith.constant 7.680000e+02 : f32
    %12 = vector.broadcast %cst_5 : f32 to vector<96x1xf32>
    %13 = arith.divf %11, %12 : vector<96x1xf32>
    %cst_6 = arith.constant 9.99999974E-6 : f32
    %14 = vector.broadcast %cst_6 : f32 to vector<96x1xf32>
    %15 = arith.addf %13, %14 : vector<96x1xf32>
    %16 = math.rsqrt %15 : vector<96x1xf32>
    %c0_7 = arith.constant 0 : index
    %c0_8 = arith.constant 0 : index
    %17 = vector.load %arg3[%c0_7, %c0_8] : memref<1x768xf32, #tpu.memory_space<vmem>>, vector<1x768xf32>
    %c0_9 = arith.constant 0 : index
    %c0_10 = arith.constant 0 : index
    %18 = vector.load %arg4[%c0_9, %c0_10] : memref<1x768xf32, #tpu.memory_space<vmem>>, vector<1x768xf32>
    %19 = vector.broadcast %16 : vector<96x1xf32> to vector<96x768xf32>
    %20 = arith.mulf %8, %19 : vector<96x768xf32>
    %21 = vector.broadcast %17 : vector<1x768xf32> to vector<96x768xf32>
    %22 = arith.mulf %20, %21 : vector<96x768xf32>
    %23 = vector.broadcast %18 : vector<1x768xf32> to vector<96x768xf32>
    %24 = arith.addf %22, %23 : vector<96x768xf32>
    %c0_11 = arith.constant 0 : index
    %c0_12 = arith.constant 0 : index
    %25 = vector.load %arg5[%c0_11, %c0_12] : memref<96x768xf32, #tpu.memory_space<vmem>>, vector<96x768xf32>
    tpu.vector_store %arg5[%c0_11, %c0_12], %24 {strides = array<i32>} : memref<96x768xf32, #tpu.memory_space<vmem>>, vector<96x768xf32>,
    return
  }
  func.func @transform_0(%arg0: i32) -> (i32, i32) {
    %c0_i32 = arith.constant 0 : i32
    %c0_i32_0 = arith.constant 0 : i32
    return %arg0, %c0_i32 : i32, i32
  }
  func.func @transform_1(%arg0: i32) -> (i32, i32) {
    %c0_i32 = arith.constant 0 : i32
    %c0_i32_0 = arith.constant 0 : i32
    return %arg0, %c0_i32 : i32, i32
  }
  func.func @transform_2(%arg0: i32) -> (i32, i32) {
    %c0_i32 = arith.constant 0 : i32
    %c0_i32_0 = arith.constant 0 : i32
    %c0_i32_1 = arith.constant 0 : i32
    return %c0_i32, %c0_i32_0 : i32, i32
  }
  func.func @transform_3(%arg0: i32) -> (i32, i32) {
    %c0_i32 = arith.constant 0 : i32
    %c0_i32_0 = arith.constant 0 : i32
    %c0_i32_1 = arith.constant 0 : i32
    return %c0_i32, %c0_i32_0 : i32, i32
  }
  func.func @transform_4(%arg0: i32) -> (i32, i32) {
    %c0_i32 = arith.constant 0 : i32
    %c0_i32_0 = arith.constant 0 : i32
    return %arg0, %c0_i32 : i32, i32
  }
}

</mosaic_0001>

<bundles_post_ra>
// kernel: tpu_custom_call.1
= control target key start
LH: loop header
LB: loop body
LE: loop exit
PB: predicated region body
PF: predicated region fallthrough
CT: control target
= control target key end

     0   :  { %9 = vsyncpa [#allocation3], 0  ;;  %s2712_s0 = inlined_call_operand.hbm [shape: f32[384,768], index: 0, kind: input, shape index: {}, may-alias: {0,4}]   ;;  %s2713_s1 = inlined_call_operand.vmem [shape: f32[384,768], index: 1, kind: input, shape index: {}]   ;;  %s2714_s2 = inlined_call_operand.vmem [shape: f32[1,768], index: 2, kind: input, shape index: {}]   ;;  %s2715_s3 = inlined_call_operand.vmem [shape: f32[1,768], index: 3, kind: input, shape index: {}]   ;;  %s2716_s4 = inlined_call_operand.hbm [shape: f32[384,768], index: 4, kind: output, shape index: {}, may-alias: {0,4}]  }
   0x1   :  { %11 = vsyncpa [#allocation3 + $0x1], 0 }
   0x2   :  { %12 = vsyncpa [#allocation4], 0 }
   0x3   :  { %14 = vsyncpa [#allocation4 + $0x1], 0  ;;  %s1492_s15 = smov 0   ;;  %s1494_s16 = smov 0  }
   0x4   :  { %s1496_s17 = smov 0   ;;  %s1498_s18 = smov 0  }
   0x5 LB: > { %s1513_s19 = sadd.s32 4294967295, %s1459_s18   ;;  %s1273_s20 = sadd.s32 4294967294, %s1459_s18   ;;  %s1459_s18 = sphi %s1498_s18, %s2905_s18   ;;  %s1455_s17 = sphi %s1496_s17, %s2904_s17   ;;  %s1451_s16 = sphi %s1494_s16, %s2903_s16   ;;  %s1447_s15 = sphi %s1492_s15, %s2902_s15  }
   0x6   : > { %s1517_s21 = sadd.s32 1, %s1459_s18   ;;  %s27_s22 = sadd.s32 1, %s1455_s17 }
   0x7   : > { %s24_s23 = ssub.s32 %s1459_s18, %s1517_s21  ;;  %p34_p0 = scmp.ne.s32.totalorder %s1455_s17, %s1451_s16 }
   0x8   : > { %p25_p1 = scmp.eq.s32.totalorder %s24_s23, 0  ;;  %p35_p2 = scmp.eq.s32.totalorder %s1459_s18, 0 }
   0x9   : > { %p40_p3 = scmp.ne.s32.totalorder %s1451_s16, %s1447_s15  ;;  %p41_p4 = scmp.eq.s32.totalorder %s1513_s19, 0 }
   0xa   : > { %s1529_s24 = scalar_select %p25_p1, %s1455_s17, %s27_s22  }
   0xb   : > { %p36_p5 = por %p35_p2, %p34_p0  ;;  %p1531_p6 = por %p41_p4, %p40_p3 }
   0xc   : > { %p132_p7 = scmp.eq.s32.totalorder %s1513_s19, 3  ;;  %p138_p8 = scmp.eq.s32.totalorder %s1273_s20, 3 }
   0xd   : > { %p1299_p9 = scmp.lt.s32.totalorder %s1459_s18, 4  ;;  %s164_s28 = sand.u32 1, %s1455_s17  }
   0xe   : > { %p1537_p10 = por %p132_p7, %p34_p0  ;;  %p1541_p11 = por %p138_p8, %p40_p3 }
   0xf   : > { %s1282_s29 = smul.u32 576, %s164_s28  ;;  %p1547_p12 = pnand %p1299_p9, %p36_p5 }
  0x10   : > { %s2778_s26 = scalar_select %p1537_p10, 1, 0 }
  0x11   : > { %s2779_s27 = scalar_select %p1541_p11, 1, 0 }
  0x12   : > { %s1300_s30 = smul.u32 9216, %s1459_s18  ;;  %s168_s9 = scalar_lea.vmem [#allocation2], %s1282_s29 }
  0x13   : > { %s176_s10 = sshll.u32 %s168_s9, 4  ;;  %s1559_s11 = scalar_lea.sflag [#allocation3], %s164_s28  ;;  %s1556_s10 = int_to_ptr.vmem [resolvable:$true] %s176_s10 }
  0x14   : > { %s1554_s8 = scalar_lea.hbm %s2712_s0, %s1300_s30  ;;  %p1365_p1 = pneg %p1547_p12 }
  0x15   : > { %s1363_s12 = scalar_lea.hbm %s1554_s8, 9216  ;;  %s1368_s20 = scalar_lea.hbm %s2712_s0, 36864 }
  0x16   : > { %p1364_p0 = scmp.ne.s32.totalorder %s1554_s8, %s1363_s12  ;;  %p1369_p4 = scmp.lt.u32.totalorder %s1554_s8, %s2712_s0 }
  0x17   : > { %p1370_p5 = scmp.lt.u32.totalorder %s1368_s20, %s1363_s12  ;;  %p1372_p8 = scmp.lt.u32.totalorder %s1363_s12, %s1554_s8 }
  0x18   : > { %p1366_p2 = pnand %p1365_p1, %p1364_p0 }
  0x19   : > { %p1371_p7 = por %p1370_p5, %p1369_p4 }
  0x1a   : > { %p1367_p3 = pneg %p1366_p2 }
  0x1b   : > { %p1373_p9 = por %p1372_p8, %p1371_p7 }
  0x1d   : > { %p1374_p13 = pnand %p1373_p9, %p1367_p3 }
  0x1f   : > { %1377 = shalt.err (!%p1374_p13)
}
  0x20   : > { %s1378_s28 = scalar_lea.vmem %s1556_s10, 9216  ;;  %s1461_s29 = smov [#allocation2]  }
  0x21   : > { %p1379_p0 = scmp.ne.s32.totalorder %s1556_s10, %s1378_s28  ;;  %s1383_s30 = sshll.u32 %s1461_s29, 4  ;;  %s1384_s30 = int_to_ptr.vmem [resolvable:$false] %s1383_s30 }
  0x22   : > { %s1385_s6 = scalar_lea.vmem %s1384_s30, 18432  ;;  %p1386_p10 = scmp.lt.s32.totalorder %s1556_s10, %s1384_s30 }
  0x23   : > { %p1381_p2 = pnand %p1379_p0, %p1365_p1  ;;  %p1387_p4 = scmp.lt.s32.totalorder %s1385_s6, %s1378_s28 }
  0x25   : > { %p1382_p11 = pneg %p1381_p2  ;;  %p1388_p5 = por %p1387_p4, %p1386_p10 }
  0x27   : > { %p1389_p7 = pnand %p1388_p5, %p1382_p11 }
  0x29   : > { %1392 = shalt.err (!%p1389_p7)
}
  0x2a   : > { %s1462_s7 = smov 768   ;;  %s1463_s9 = smov 48  }
  0x2b   : > { %1294 = dma.hbm_to_vmem [thread:$0]  (!%p1547_p12), %s1554_s8, 9216, %s1556_s10, %s1559_s11, %s1462_s7, %s1462_s7, %s1463_s9  }
  0x2c   : > { %p194_p13 = scmp.lt.s32.totalorder %s1459_s18, 5  ;;  %p2781_p1 = scmp.ge.s32.totalorder %s1459_s18, 1 }
  0x2e   : > { %p195_p3 = pnand %p2781_p1, %p194_p13 }
  0x30   : > { %198 = sbr.rel (%p195_p3) target bundleno = 487 (0x1e7), region = 36 }
  0x37   : > { %s1591_s12 = sand.u32 1, %s1451_s16  }
  0x38   : > { %s1284_s13 = smul.u32 576, %s1591_s12  ;;  %s201_s14 = scalar_lea.sflag [#allocation3], %s1591_s12 }
  0x3a   : > { %s1597_s20 = scalar_lea.vmem [#allocation2], %s1284_s13 }
  0x3b   : > { %1438 = dma.done.wait (%p1531_p6), %s201_s14, 9216  }
  0x3c   : > { %1440 = vsyncadd (%p1531_p6), %s201_s14, 4294958080  ;;  %s236_s5 = smul.u32 12, %s1513_s19  ;;  %v256_v0 = vld [vmem:[%s1597_s20 + $0x60] sm:$0xff]  ;;  %v257_v1 = vld [vmem:[%s1597_s20 + $0x68] sm:$0xff]  ;;  %s2381_s30 = scalar_lea.vmem [#allocation5], %s1284_s13 }
  0x3d   : > { %v258_v2 = vld [vmem:[%s1597_s20 + $0x70] sm:$0xff]  ;;  %v259_v3 = vld [vmem:[%s1597_s20 + $0x78] sm:$0xff]  ;;  %v260_v7 = vld [vmem:[%s1597_s20 + $0x80] sm:$0xff]  ;;  %s1301_s6 = smul.u32 9216, %s1513_s19  ;;  %s1188_s7 = sshll.u32 %s2381_s30, 4  ;;  %s2659_s7 = int_to_ptr.vmem [resolvable:$true] %s1188_s7 }
  0x3e   : > { %p237_p10 = scmp.lt.s32.totalorder %s236_s5, 47  ;;  %v244_v13 = vld [vmem:[%s1597_s20] sm:$0xff]  ;;  %v245_v14 = vld [vmem:[%s1597_s20 + $0x8] sm:$0xff]  ;;  %v246_v15 = vld [vmem:[%s1597_s20 + $0x10] sm:$0xff]  ;;  %s1174_s14 = scalar_lea.sflag [#allocation4], %s1591_s12 }
  0x3f   : > { %v261_v16 = vld [vmem:[%s1597_s20 + $0x88] sm:$0xff]  ;;  %v247_v20 = vld [vmem:[%s1597_s20 + $0x18] sm:$0xff]  ;;  %v248_v26 = vld [vmem:[%s1597_s20 + $0x20] sm:$0xff]  ;;  %s2657_s13 = scalar_lea.hbm %s2716_s4, %s1301_s6  ;;  %p2900_p11 = scmp.ne.s32.totalorder %s2778_s26, 0 }
  0x40   : > { %s2907_s5 = smov (!%p237_p10, %s236_s5), 47  ;;  %v249_v32 = vld [vmem:[%s1597_s20 + $0x28] sm:$0xff]  ;;  %v262_v33 = vld [vmem:[%s1597_s20 + $0x90] sm:$0xff]  ;;  %v263_v34 = vld [vmem:[%s1597_s20 + $0x98] sm:$0xff] }
  0x41   : > { %s1285_s8 = smul.u32 48, %s2907_s5  ;;  %v264_v40 = vld [vmem:[%s1597_s20 + $0xa0] sm:$0xff]  ;;  %v265_v41 = vld [vmem:[%s1597_s20 + $0xa8] sm:$0xff]  ;;  %v266_v48 = vld [vmem:[%s1597_s20 + $0xb0] sm:$0xff]  ;;  %s1464_s5 = smov [#allocation5]  }
  0x42   : > { %v267_v54 = vld [vmem:[%s1597_s20 + $0xb8] sm:$0xff]  ;;  %v250_v56 = vld [vmem:[%s1597_s20 + $0x30] sm:$0xff]  ;;  %v252_v63 = vld [vmem:[%s1597_s20 + $0x40] sm:$0xff] }
  0x43   : > { %s1610_s11 = scalar_lea.vmem %s2713_s1, %s1285_s8  ;;  %v251_v57 = vld [vmem:[%s1597_s20 + $0x38] sm:$0xff]  ;;  %s1397_s8 = sshll.u32 %s1464_s5, 4  ;;  %s1398_s8 = int_to_ptr.vmem [resolvable:$false] %s1397_s8 }
  0x44   : > { %v328_v4 = vld [vmem:[%s1610_s11 + $0x60] sm:$0xff]  ;;  %v329_v5 = vld [vmem:[%s1610_s11 + $0x68] sm:$0xff]  ;;  %v330_v6 = vld [vmem:[%s1610_s11 + $0x70] sm:$0xff]  ;;  %s1399_s10 = scalar_lea.vmem %s1398_s8, 18432  ;;  %p1400_p9 = scmp.lt.s32.totalorder %s2659_s7, %s1398_s8 }
  0x45   : > { %v331_v8 = vld [vmem:[%s1610_s11 + $0x78] sm:$0xff]  ;;  %v332_v9 = vld [vmem:[%s1610_s11 + $0x80] sm:$0xff]  ;;  %v1619_v10 = vadd.f32 %v328_v4, %v256_v0  ;;  %v1621_v11 = vadd.f32 %v329_v5, %v257_v1  ;;  %v1623_v12 = vadd.f32 %v330_v6, %v258_v2  ;;  %v333_v17 = vld [vmem:[%s1610_s11 + $0x88] sm:$0xff] }
  0x46   : > { %v1630_v18 = vadd.f32 %v331_v8, %v259_v3  ;;  %v1635_v21 = vadd.f32 %v332_v9, %v260_v7  ;;  %v316_v22 = vld [vmem:[%s1610_s11] sm:$0xff]  ;;  %v317_v23 = vld [vmem:[%s1610_s11 + $0x8] sm:$0xff]  ;;  %v318_v24 = vld [vmem:[%s1610_s11 + $0x10] sm:$0xff]  ;;  %v1653_v35 = vadd.f32 %v333_v17, %v261_v16 }
  0x47   : > { %v474_v19 = vadd.f32 %v1621_v11, %v1619_v10  ;;  %v319_v27 = vld [vmem:[%s1610_s11 + $0x18] sm:$0xff]  ;;  %v320_v28 = vld [vmem:[%s1610_s11 + $0x20] sm:$0xff]  ;;  %v1644_v29 = vadd.f32 %v316_v22, %v244_v13  ;;  %v1646_v30 = vadd.f32 %v317_v23, %v245_v14  ;;  %v1648_v31 = vadd.f32 %v318_v24, %v246_v15  ;;  %v321_v37 = vld [vmem:[%s1610_s11 + $0x28] sm:$0xff] }
  0x48   : > { %v1657_v38 = vadd.f32 %v319_v27, %v247_v20  ;;  %v1663_v42 = vadd.f32 %v320_v28, %v248_v26  ;;  %v334_v43 = vld [vmem:[%s1610_s11 + $0x90] sm:$0xff]  ;;  %v335_v44 = vld [vmem:[%s1610_s11 + $0x98] sm:$0xff]  ;;  %v336_v45 = vld [vmem:[%s1610_s11 + $0xa0] sm:$0xff]  ;;  %v1677_v53 = vadd.f32 %v321_v37, %v249_v32 }
  0x49   : > { %v475_v25 = vadd.f32 %v474_v19, %v1623_v12  ;;  %v460_v39 = vadd.f32 %v1646_v30, %v1644_v29  ;;  %v337_v49 = vld [vmem:[%s1610_s11 + $0xa8] sm:$0xff]  ;;  %v338_v50 = vld [vmem:[%s1610_s11 + $0xb0] sm:$0xff]  ;;  %v1673_v51 = vadd.f32 %v334_v43, %v262_v33  ;;  %v1675_v52 = vadd.f32 %v335_v44, %v263_v34  ;;  %v339_v60 = vld [vmem:[%s1610_s11 + $0xb8] sm:$0xff] }
  0x4a   : > { %v1680_v55 = vadd.f32 %v336_v45, %v264_v40  ;;  %v1687_v61 = vadd.f32 %v337_v49, %v265_v41  ;;  %v253_v0 = vld [vmem:[%s1597_s20 + $0x48] sm:$0xff]  ;;  %v1693_v1 = vadd.f32 %v338_v50, %v266_v48  ;;  %v322_v2 = vld [vmem:[%s1610_s11 + $0x30] sm:$0xff]  ;;  %v323_v3 = vld [vmem:[%s1610_s11 + $0x38] sm:$0xff]  ;;  %v1707_v15 = vadd.f32 %v339_v60, %v267_v54 }
  0x4b   : > { %v476_v36 = vadd.f32 %v475_v25, %v1630_v18  ;;  %v461_v47 = vadd.f32 %v460_v39, %v1648_v31  ;;  %v481_v62 = vadd.f32 %v1675_v52, %v1673_v51  ;;  %v324_v4 = vld [vmem:[%s1610_s11 + $0x40] sm:$0xff]  ;;  %v254_v7 = vld [vmem:[%s1597_s20 + $0x50] sm:$0xff]  ;;  %v325_v8 = vld [vmem:[%s1610_s11 + $0x48] sm:$0xff]  ;;  %v1703_v13 = vadd.f32 %v322_v2, %v250_v56 }
  0x4c   : > { %v326_v9 = vld [vmem:[%s1610_s11 + $0x50] sm:$0xff]  ;;  %v1705_v14 = vadd.f32 %v323_v3, %v251_v57  ;;  %v255_v16 = vld [vmem:[%s1597_s20 + $0x58] sm:$0xff]  ;;  %v1710_v17 = vadd.f32 %v324_v4, %v252_v63  ;;  %v1717_v25 = vadd.f32 %v325_v8, %v253_v0  ;;  %v276_v27 = vld [vmem:[%s1597_s20 + $0x100] sm:$0xff] }
  0x4d   : > { %v477_v46 = vadd.f32 %v476_v36, %v1635_v21  ;;  %v462_v59 = vadd.f32 %v461_v47, %v1657_v38  ;;  %v482_v6 = vadd.f32 %v481_v62, %v1680_v55  ;;  %v274_v19 = vld [vmem:[%s1597_s20 + $0xf0] sm:$0xff]  ;;  %v275_v20 = vld [vmem:[%s1597_s20 + $0xf8] sm:$0xff]  ;;  %v277_v28 = vld [vmem:[%s1597_s20 + $0x108] sm:$0xff]  ;;  %v1723_v32 = vadd.f32 %v326_v9, %v254_v7 }
  0x4e   : > { %v327_v24 = vld [vmem:[%s1610_s11 + $0x58] sm:$0xff]  ;;  %v467_v26 = vadd.f32 %v1705_v14, %v1703_v13  ;;  %v346_v33 = vld [vmem:[%s1610_s11 + $0xf0] sm:$0xff]  ;;  %v348_v36 = vld [vmem:[%s1610_s11 + $0x100] sm:$0xff] }
  0x4f   : > { %v478_v58 = vadd.f32 %v477_v46, %v1653_v35  ;;  %v463_v5 = vadd.f32 %v462_v59, %v1663_v42  ;;  %v483_v23 = vadd.f32 %v482_v6, %v1687_v61  ;;  %v347_v34 = vld [vmem:[%s1610_s11 + $0xf8] sm:$0xff]  ;;  %v278_v40 = vld [vmem:[%s1597_s20 + $0x110] sm:$0xff]  ;;  %v349_v41 = vld [vmem:[%s1610_s11 + $0x108] sm:$0xff]  ;;  %v1733_v44 = vadd.f32 %v346_v33, %v274_v19 }
  0x50   : > { %v468_v39 = vadd.f32 %v467_v26, %v1710_v17  ;;  %v350_v43 = vld [vmem:[%s1610_s11 + $0x110] sm:$0xff]  ;;  %v1735_v45 = vadd.f32 %v347_v34, %v275_v20  ;;  %v1737_v46 = vadd.f32 %v327_v24, %v255_v16  ;;  %v279_v47 = vld [vmem:[%s1597_s20 + $0x118] sm:$0xff]  ;;  %v1740_v48 = vadd.f32 %v348_v36, %v276_v27  ;;  %v268_v49 = vld [vmem:[%s1597_s20 + $0xc0] sm:$0xff] }
  0x51   : > { %479 = vadd.xlane.f32.xlu1 %v478_v58  ;;  %v464_v22 = vadd.f32 %v463_v5, %v1677_v53  ;;  %v484_v37 = vadd.f32 %v483_v23, %v1693_v1  ;;  %v269_v50 = vld [vmem:[%s1597_s20 + $0xc8] sm:$0xff]  ;;  %v351_v57 = vld [vmem:[%s1610_s11 + $0x118] sm:$0xff]  ;;  %v1747_v58 = vadd.f32 %v349_v41, %v277_v28  ;;  %v270_v60 = vld [vmem:[%s1597_s20 + $0xd0] sm:$0xff]  ;;  %v1753_v63 = vadd.f32 %v350_v43, %v278_v40 }
  0x52   : > { %v469_v56 = vadd.f32 %v468_v39, %v1717_v25  ;;  %v495_v59 = vadd.f32 %v1735_v45, %v1733_v44  ;;  %v271_v62 = vld [vmem:[%s1597_s20 + $0xd8] sm:$0xff]  ;;  %v340_v0 = vld [vmem:[%s1610_s11 + $0xc0] sm:$0xff]  ;;  %v341_v2 = vld [vmem:[%s1610_s11 + $0xc8] sm:$0xff]  ;;  %v1767_v19 = vadd.f32 %v351_v57, %v279_v47 }
  0x53   : > { %465 = vadd.xlane.f32.xlu0 %v464_v22  ;;  %v485_v54 = vadd.f32 %v484_v37, %v1707_v15  ;;  %v342_v3 = vld [vmem:[%s1610_s11 + $0xd0] sm:$0xff]  ;;  %v272_v6 = vld [vmem:[%s1597_s20 + $0xe0] sm:$0xff]  ;;  %v343_v7 = vld [vmem:[%s1610_s11 + $0xd8] sm:$0xff]  ;;  %v1763_v9 = vadd.f32 %v340_v0, %v268_v49  ;;  %v1765_v16 = vadd.f32 %v341_v2, %v269_v50 }
  0x54   : > { %v470_v4 = vadd.f32 %v469_v56, %v1723_v32  ;;  %v496_v5 = vadd.f32 %v495_v59, %v1740_v48  ;;  %v344_v8 = vld [vmem:[%s1610_s11 + $0xe0] sm:$0xff]  ;;  %v273_v20 = vld [vmem:[%s1597_s20 + $0xe8] sm:$0xff]  ;;  %v1770_v22 = vadd.f32 %v342_v3, %v270_v60  ;;  %v286_v23 = vld [vmem:[%s1597_s20 + $0x150] sm:$0xff]  ;;  %v1777_v33 = vadd.f32 %v343_v7, %v271_v62 }
  0x55   : > { %486 = vadd.xlane.f32.xlu1 %v485_v54  ;;  %v287_v24 = vld [vmem:[%s1597_s20 + $0x158] sm:$0xff]  ;;  %v345_v28 = vld [vmem:[%s1610_s11 + $0xe8] sm:$0xff]  ;;  %v488_v34 = vadd.f32 %v1765_v16, %v1763_v9  ;;  %v288_v36 = vld [vmem:[%s1597_s20 + $0x160] sm:$0xff]  ;;  %v1783_v39 = vadd.f32 %v344_v8, %v272_v6 }
  0x56   : > { %v471_v26 = vadd.f32 %v470_v4, %v1737_v46  ;;  %v497_v27 = vadd.f32 %v496_v5, %v1747_v58  ;;  %v289_v37 = vld [vmem:[%s1597_s20 + $0x168] sm:$0xff]  ;;  %v358_v40 = vld [vmem:[%s1610_s11 + $0x150] sm:$0xff]  ;;  %v359_v41 = vld [vmem:[%s1610_s11 + $0x158] sm:$0xff]  ;;  %v1797_v60 = vadd.f32 %v345_v28, %v273_v20 }
  0x57   : > { %v360_v43 = vld [vmem:[%s1610_s11 + $0x160] sm:$0xff]  ;;  %v489_v49 = vadd.f32 %v488_v34, %v1770_v22  ;;  %v290_v50 = vld [vmem:[%s1597_s20 + $0x170] sm:$0xff]  ;;  %v361_v54 = vld [vmem:[%s1610_s11 + $0x168] sm:$0xff]  ;;  %v1793_v57 = vadd.f32 %v358_v40, %v286_v23  ;;  %v1795_v59 = vadd.f32 %v359_v41, %v287_v24 }
  0x58   : > { %472 = vadd.xlane.f32.xlu0 %v471_v26  ;;  %v498_v47 = vadd.f32 %v497_v27, %v1753_v63  ;;  %v362_v56 = vld [vmem:[%s1610_s11 + $0x170] sm:$0xff]  ;;  %v291_v62 = vld [vmem:[%s1597_s20 + $0x178] sm:$0xff]  ;;  %v1800_v0 = vadd.f32 %v360_v43, %v288_v36  ;;  %v280_v2 = vld [vmem:[%s1597_s20 + $0x120] sm:$0xff]  ;;  %v1807_v7 = vadd.f32 %v361_v54, %v289_v37 }
  0x59   : > { %2782 = vst [vmem:[#allocation8_spill] sm:$0xff] %v1793_v57  ;;  %2783 = vst [vmem:[#allocation9_spill] sm:$0xff] %v1795_v59  ;;  %v281_v3 = vld [vmem:[%s1597_s20 + $0x128] sm:$0xff]  ;;  %v490_v5 = vadd.f32 %v489_v49, %v1777_v33  ;;  %v363_v6 = vld [vmem:[%s1610_s11 + $0x178] sm:$0xff]  ;;  %v509_v8 = vadd.f32 %v1795_v59, %v1793_v57  ;;  %v1813_v24 = vadd.f32 %v362_v56, %v290_v50 }
  0x5a   : > { %2784 = vst [vmem:[#allocation10_spill] sm:$0xff] %v1800_v0  ;;  %v499_v4 = vadd.f32 %v498_v47, %v1767_v19  ;;  %2785 = vst [vmem:[#allocation11_spill] sm:$0xff] %v1807_v7  ;;  %v282_v20 = vld [vmem:[%s1597_s20 + $0x130] sm:$0xff]  ;;  %v283_v23 = vld [vmem:[%s1597_s20 + $0x138] sm:$0xff]  ;;  %v1827_v49 = vadd.f32 %v363_v6, %v291_v62 }
  0x5b   : > { %2786 = vst [vmem:[#allocation12_spill] sm:$0xff] %v1813_v24  ;;  %v352_v26 = vld [vmem:[%s1610_s11 + $0x120] sm:$0xff]  ;;  %v353_v27 = vld [vmem:[%s1610_s11 + $0x128] sm:$0xff]  ;;  %v354_v28 = vld [vmem:[%s1610_s11 + $0x130] sm:$0xff]  ;;  %v491_v34 = vadd.f32 %v490_v5, %v1783_v39  ;;  %v510_v36 = vadd.f32 %v509_v8, %v1800_v0 }
  0x5c   : > { %500 = vadd.xlane.f32.xlu1 %v499_v4  ;;  %v284_v37 = vld [vmem:[%s1597_s20 + $0x140] sm:$0xff]  ;;  %v355_v40 = vld [vmem:[%s1610_s11 + $0x138] sm:$0xff]  ;;  %v1823_v43 = vadd.f32 %v352_v26, %v280_v2  ;;  %v1825_v47 = vadd.f32 %v353_v27, %v281_v3  ;;  %2789 = vst [vmem:[#allocation15_spill] sm:$0xff] %v1827_v49  ;;  %v285_v50 = vld [vmem:[%s1597_s20 + $0x148] sm:$0xff]  ;;  %v1830_v54 = vadd.f32 %v354_v28, %v282_v20 }
  0x5d   : > { %v356_v41 = vld [vmem:[%s1610_s11 + $0x140] sm:$0xff]  ;;  %v298_v56 = vld [vmem:[%s1597_s20 + $0x1b0] sm:$0xff]  ;;  %v299_v4 = vld [vmem:[%s1597_s20 + $0x1b8] sm:$0xff]  ;;  %v492_v5 = vadd.f32 %v491_v34, %v1797_v60  ;;  %v511_v8 = vadd.f32 %v510_v36, %v1807_v7  ;;  %v1837_v26 = vadd.f32 %v355_v40, %v283_v23 }
  0x5e   : > { %2787 = vst [vmem:[#allocation13_spill] sm:$0xff] %v1823_v43  ;;  %2788 = vst [vmem:[#allocation14_spill] sm:$0xff] %v1825_v47  ;;  %v357_v2 = vld [vmem:[%s1610_s11 + $0x148] sm:$0xff]  ;;  %v502_v3 = vadd.f32 %v1825_v47, %v1823_v43  ;;  %v300_v62 = vld [vmem:[%s1597_s20 + $0x1c0] sm:$0xff]  ;;  %v1843_v20 = vadd.f32 %v356_v41, %v284_v37 }
  0x5f   : > { %2790 = vst [vmem:[#allocation16_spill] sm:$0xff] %v1830_v54  ;;  %2791 = vst [vmem:[#allocation17_spill] sm:$0xff] %v1837_v26  ;;  %v301_v6 = vld [vmem:[%s1597_s20 + $0x1c8] sm:$0xff]  ;;  %v370_v27 = vld [vmem:[%s1610_s11 + $0x1b0] sm:$0xff]  ;;  %493 = vadd.xlane.f32.xlu0 %v492_v5  ;;  %v512_v34 = vadd.f32 %v511_v8, %v1813_v24  ;;  %v1857_v41 = vadd.f32 %v357_v2, %v285_v50 }
  0x60   : > { %2792 = vst [vmem:[#allocation18_spill] sm:$0xff] %v1843_v20  ;;  %v371_v28 = vld [vmem:[%s1610_s11 + $0x1b8] sm:$0xff]  ;;  %v372_v0 = vld [vmem:[%s1610_s11 + $0x1c0] sm:$0xff]  ;;  %v503_v23 = vadd.f32 %v502_v3, %v1830_v54  ;;  %v302_v36 = vld [vmem:[%s1597_s20 + $0x1d0] sm:$0xff]  ;;  %v1853_v59 = vadd.f32 %v370_v27, %v298_v56 }
  0x61   : > { %v373_v40 = vld [vmem:[%s1610_s11 + $0x1c8] sm:$0xff]  ;;  %v374_v7 = vld [vmem:[%s1610_s11 + $0x1d0] sm:$0xff]  ;;  %v1855_v37 = vadd.f32 %v371_v28, %v299_v4  ;;  %2795 = vst [vmem:[#allocation21_spill] sm:$0xff] %v1857_v41  ;;  %v303_v47 = vld [vmem:[%s1597_s20 + $0x1d8] sm:$0xff]  ;;  %v1860_v5 = vadd.f32 %v372_v0, %v300_v62  ;;  %v513_v24 = vadd.f32 %v512_v34, %v1827_v49 }
  0x62   : > { %2793 = vst [vmem:[#allocation19_spill] sm:$0xff] %v1853_v59  ;;  %v292_v8 = vld [vmem:[%s1597_s20 + $0x180] sm:$0xff]  ;;  %v293_v3 = vld [vmem:[%s1597_s20 + $0x188] sm:$0xff]  ;;  %v504_v54 = vadd.f32 %v503_v23, %v1837_v26  ;;  %v375_v56 = vld [vmem:[%s1610_s11 + $0x1d8] sm:$0xff]  ;;  %v1867_v27 = vadd.f32 %v373_v40, %v301_v6  ;;  %v1873_v0 = vadd.f32 %v374_v7, %v302_v36 }
  0x63   : > { %2794 = vst [vmem:[#allocation20_spill] sm:$0xff] %v1855_v37  ;;  %2796 = vst [vmem:[#allocation22_spill] sm:$0xff] %v1860_v5  ;;  %v523_v4 = vadd.f32 %v1855_v37, %v1853_v59  ;;  %v294_v50 = vld [vmem:[%s1597_s20 + $0x190] sm:$0xff]  ;;  %v295_v2 = vld [vmem:[%s1597_s20 + $0x198] sm:$0xff]  ;;  %514 = vadd.xlane.f32.xlu1 %v513_v24  ;;  %v1887_v36 = vadd.f32 %v375_v56, %v303_v47 }
  0x64   : > { %2797 = vst [vmem:[#allocation23_spill] sm:$0xff] %v1867_v27  ;;  %2798 = vst [vmem:[#allocation24_spill] sm:$0xff] %v1873_v0  ;;  %v364_v62 = vld [vmem:[%s1610_s11 + $0x180] sm:$0xff]  ;;  %v365_v28 = vld [vmem:[%s1610_s11 + $0x188] sm:$0xff]  ;;  %v505_v34 = vadd.f32 %v504_v54, %v1843_v20 }
  0x65   : > { %v366_v43 = vld [vmem:[%s1610_s11 + $0x190] sm:$0xff]  ;;  %v524_v6 = vadd.f32 %v523_v4, %v1860_v5  ;;  %v296_v23 = vld [vmem:[%s1597_s20 + $0x1a0] sm:$0xff]  ;;  %v367_v40 = vld [vmem:[%s1610_s11 + $0x198] sm:$0xff]  ;;  %v1883_v59 = vadd.f32 %v364_v62, %v292_v8  ;;  %v1885_v7 = vadd.f32 %v365_v28, %v293_v3  ;;  %2801 = vst [vmem:[#allocation27_spill] sm:$0xff] %v1887_v36 }
  0x66   : > { %v368_v37 = vld [vmem:[%s1610_s11 + $0x1a0] sm:$0xff]  ;;  %v297_v49 = vld [vmem:[%s1597_s20 + $0x1a8] sm:$0xff]  ;;  %v1890_v24 = vadd.f32 %v366_v43, %v294_v50  ;;  %v310_v54 = vld [vmem:[%s1597_s20 + $0x210] sm:$0xff]  ;;  %v506_v5 = vadd.f32 %v505_v34, %v1857_v41  ;;  %v1897_v62 = vadd.f32 %v367_v40, %v295_v2 }
  0x67   : > { %2799 = vst [vmem:[#allocation25_spill] sm:$0xff] %v1883_v59  ;;  %2800 = vst [vmem:[#allocation26_spill] sm:$0xff] %v1885_v7  ;;  %v311_v4 = vld [vmem:[%s1597_s20 + $0x218] sm:$0xff]  ;;  %v525_v20 = vadd.f32 %v524_v6, %v1867_v27  ;;  %v369_v8 = vld [vmem:[%s1610_s11 + $0x1a8] sm:$0xff]  ;;  %v516_v3 = vadd.f32 %v1885_v7, %v1883_v59  ;;  %v1903_v43 = vadd.f32 %v368_v37, %v296_v23 }
  0x68   : > { %2802 = vst [vmem:[#allocation28_spill] sm:$0xff] %v1890_v24  ;;  %2803 = vst [vmem:[#allocation29_spill] sm:$0xff] %v1897_v62  ;;  %v312_v47 = vld [vmem:[%s1597_s20 + $0x220] sm:$0xff]  ;;  %v313_v56 = vld [vmem:[%s1597_s20 + $0x228] sm:$0xff]  ;;  %507 = vadd.xlane.f32.xlu0 %v506_v5  ;;  %v1917_v23 = vadd.f32 %v369_v8, %v297_v49 }
  0x69   : > { %v382_v50 = vld [vmem:[%s1610_s11 + $0x210] sm:$0xff]  ;;  %v383_v28 = vld [vmem:[%s1610_s11 + $0x218] sm:$0xff]  ;;  %v384_v26 = vld [vmem:[%s1610_s11 + $0x220] sm:$0xff]  ;;  %v526_v34 = vadd.f32 %v525_v20, %v1873_v0  ;;  %v517_v2 = vadd.f32 %v516_v3, %v1890_v24 }
  0x6a   : > { %v314_v6 = vld [vmem:[%s1597_s20 + $0x230] sm:$0xff]  ;;  %v385_v40 = vld [vmem:[%s1610_s11 + $0x228] sm:$0xff]  ;;  %v1913_v7 = vadd.f32 %v382_v50, %v310_v54  ;;  %v1915_v37 = vadd.f32 %v383_v28, %v311_v4  ;;  %v315_v59 = vld [vmem:[%s1597_s20 + $0x238] sm:$0xff]  ;;  %v1920_v5 = vadd.f32 %v384_v26, %v312_v47 }
  0x6b   : > { %v386_v27 = vld [vmem:[%s1610_s11 + $0x230] sm:$0xff]  ;;  %v304_v20 = vld [vmem:[%s1597_s20 + $0x1e0] sm:$0xff]  ;;  %v305_v3 = vld [vmem:[%s1597_s20 + $0x1e8] sm:$0xff]  ;;  %v527_v0 = vadd.f32 %v526_v34, %v1887_v36  ;;  %v518_v24 = vadd.f32 %v517_v2, %v1897_v62  ;;  %v1927_v54 = vadd.f32 %v385_v40, %v313_v56 }
  0x6c   : > { %2804 = vst [vmem:[#allocation30_spill] sm:$0xff] %v1913_v7  ;;  %2805 = vst [vmem:[#allocation31_spill] sm:$0xff] %v1915_v37  ;;  %v387_v41 = vld [vmem:[%s1610_s11 + $0x238] sm:$0xff]  ;;  %v537_v4 = vadd.f32 %v1915_v37, %v1913_v7  ;;  %v306_v49 = vld [vmem:[%s1597_s20 + $0x1f0] sm:$0xff]  ;;  %v1933_v50 = vadd.f32 %v386_v27, %v314_v6 }
  0x6d   : > { %v307_v8 = vld [vmem:[%s1597_s20 + $0x1f8] sm:$0xff]  ;;  %v376_v26 = vld [vmem:[%s1610_s11 + $0x1e0] sm:$0xff]  ;;  %v377_v47 = vld [vmem:[%s1610_s11 + $0x1e8] sm:$0xff]  ;;  %528 = vadd.xlane.f32.xlu1 %v527_v0  ;;  %v519_v34 = vadd.f32 %v518_v24, %v1903_v43  ;;  %v1945_v37 = vadd.f32 %v387_v41, %v315_v59 }
  0x6e   : > { %v378_v28 = vld [vmem:[%s1610_s11 + $0x1f0] sm:$0xff]  ;;  %v538_v2 = vadd.f32 %v537_v4, %v1920_v5  ;;  %v379_v56 = vld [vmem:[%s1610_s11 + $0x1f8] sm:$0xff]  ;;  %v1941_v40 = vadd.f32 %v376_v26, %v304_v20  ;;  %v1943_v36 = vadd.f32 %v377_v47, %v305_v3  ;;  %v308_v7 = vld [vmem:[%s1597_s20 + $0x200] sm:$0xff] }
  0x6f   : > { %v380_v27 = vld [vmem:[%s1610_s11 + $0x200] sm:$0xff]  ;;  %v1949_v6 = vadd.f32 %v378_v28, %v306_v49  ;;  %v520_v62 = vadd.f32 %v519_v34, %v1917_v23  ;;  %v1953_v0 = vadd.f32 %v379_v56, %v307_v8  ;;  %v309_v4 = vld [vmem:[%s1597_s20 + $0x208] sm:$0xff]  ;;  %s1393_s20 = scalar_lea.vmem %s2659_s7, 9216 }
  0x70   : > { %v539_v57 = vadd.f32 %v538_v2, %v1927_v54  ;;  %v530_v24 = vadd.f32 %v1943_v36, %v1941_v40  ;;  %v381_v20 = vld [vmem:[%s1610_s11 + $0x208] sm:$0xff]  ;;  %v1960_v59 = vadd.f32 %v380_v27, %v308_v7  ;;  %p1394_p6 = scmp.ne.s32.totalorder %s2659_s7, %s1393_s20  ;;  %p1401_p0 = scmp.lt.s32.totalorder %s1399_s10, %s1393_s20 }
  0x71   : > { %521 = vadd.xlane.f32.xlu0 %v520_v62  ;;  %v1964_v26 = vadd.f32 %v381_v20, %v309_v4 }
  0x72   : > { %v540_v3 = vadd.f32 %v539_v57, %v1933_v50  ;;  %v531_v41 = vadd.f32 %v530_v24, %v1949_v6  ;;  %p1395_p12 = pnand %p1394_p6, %p2900_p11  ;;  %p1402_p2 = por %p1401_p0, %p1400_p9 }
  0x74   : > { %v541_v49 = vadd.f32 %v540_v3, %v1945_v37  ;;  %v532_v47 = vadd.f32 %v531_v41, %v1953_v0  ;;  %p1396_p8 = pneg %p1395_p12 }
  0x76   : > { %542 = vadd.xlane.f32.xlu1 %v541_v49  ;;  %v533_v8 = vadd.f32 %v532_v47, %v1960_v59  ;;  %p1403_p4 = pnand %p1402_p2, %p1396_p8 }
  0x78   : > { %v534_v28 = vadd.f32 %v533_v8, %v1964_v26 }
  0x7a   : > { %535 = vadd.xlane.f32.xlu0 %v534_v28 }
  0xde   : > { %v480_v34 = vpop.xlane.xlu1 %479 }
  0xdf   : > { %v547_v62 = vmul.f32 0.0013020834, %v480_v34 }
  0xe0   : > { %v466_v56 = vpop.xlane.xlu0 %465 }
  0xe1   : > { %v1970_v57 = vsub.f32 %v1619_v10, %v547_v62  ;;  %v1973_v7 = vsub.f32 %v1621_v11, %v547_v62  ;;  %v1976_v2 = vsub.f32 %v1623_v12, %v547_v62  ;;  %v1979_v27 = vsub.f32 %v1630_v18, %v547_v62 }
  0xe2   : > { %v545_v24 = vmul.f32 0.0013020834, %v466_v56  ;;  %v1986_v10 = vsub.f32 %v1635_v21, %v547_v62  ;;  %v1989_v11 = vsub.f32 %v1653_v35, %v547_v62  ;;  %v487_v21 = vpop.xlane.xlu1 %486 }
  0xe3   : > { %2806 = vst [vmem:[#allocation32_spill] sm:$0xff] %v1976_v2  ;;  %2807 = vst [vmem:[#allocation33_spill] sm:$0xff] %v1979_v27  ;;  %v641_v4 = vmul.f32 %v1970_v57, %v1970_v57  ;;  %v642_v20 = vmul.f32 %v1973_v7, %v1973_v7  ;;  %v643_v12 = vmul.f32 %v1976_v2, %v1976_v2  ;;  %v548_v28 = vmul.f32 0.0013020834, %v487_v21 }
  0xe4   : > { %2808 = vst [vmem:[#allocation34_spill] sm:$0xff] %v1986_v10  ;;  %2809 = vst [vmem:[#allocation35_spill] sm:$0xff] %v1989_v11  ;;  %v1994_v3 = vsub.f32 %v1644_v29, %v545_v24  ;;  %v1997_v18 = vsub.f32 %v1646_v30, %v545_v24  ;;  %v2000_v41 = vsub.f32 %v1648_v31, %v545_v24 }
  0xe5   : > { %v2003_v49 = vsub.f32 %v1657_v38, %v545_v24  ;;  %v2006_v47 = vsub.f32 %v1663_v42, %v545_v24  ;;  %v2009_v35 = vsub.f32 %v1677_v53, %v545_v24  ;;  %v644_v29 = vmul.f32 %v1979_v27, %v1979_v27 }
  0xe6   : > { %v715_v8 = vadd.f32 %v642_v20, %v641_v4  ;;  %v629_v30 = vmul.f32 %v1994_v3, %v1994_v3  ;;  %v630_v31 = vmul.f32 %v1997_v18, %v1997_v18  ;;  %v631_v38 = vmul.f32 %v2000_v41, %v2000_v41  ;;  %v473_v20 = vpop.xlane.xlu0 %472 }
  0xe7   : > { %v645_v42 = vmul.f32 %v1986_v10, %v1986_v10  ;;  %v646_v53 = vmul.f32 %v1989_v11, %v1989_v11  ;;  %v632_v62 = vmul.f32 %v2003_v49, %v2003_v49  ;;  %v2026_v24 = vsub.f32 %v1673_v51, %v548_v28 }
  0xe8   : > { %v716_v34 = vadd.f32 %v715_v8, %v643_v12  ;;  %v701_v56 = vadd.f32 %v630_v31, %v629_v30  ;;  %v2029_v4 = vsub.f32 %v1675_v52, %v548_v28  ;;  %v633_v21 = vmul.f32 %v2006_v47, %v2006_v47 }
  0xe9   : > { %v634_v10 = vmul.f32 %v2009_v35, %v2009_v35  ;;  %v2036_v12 = vsub.f32 %v1680_v55, %v548_v28  ;;  %v546_v8 = vmul.f32 0.0013020834, %v473_v20  ;;  %v2039_v30 = vsub.f32 %v1687_v61, %v548_v28 }
  0xea   : > { %v717_v27 = vadd.f32 %v716_v34, %v644_v29  ;;  %v702_v11 = vadd.f32 %v701_v56, %v631_v38  ;;  %v2042_v51 = vsub.f32 %v1693_v1, %v548_v28  ;;  %v2045_v31 = vsub.f32 %v1707_v15, %v548_v28 }
  0xeb   : > { %2810 = vst [vmem:[#allocation36_spill] sm:$0xff] %v2039_v30  ;;  %v647_v2 = vmul.f32 %v2026_v24, %v2026_v24  ;;  %v648_v29 = vmul.f32 %v2029_v4, %v2029_v4  ;;  %v2052_v34 = vsub.f32 %v1703_v13, %v546_v8  ;;  %v2055_v61 = vsub.f32 %v1705_v14, %v546_v8 }
  0xec   : > { %2811 = vst [vmem:[#allocation37_spill] sm:$0xff] %v2042_v51  ;;  %v718_v52 = vadd.f32 %v717_v27, %v645_v42  ;;  %v703_v55 = vadd.f32 %v702_v11, %v632_v62  ;;  %v2058_v1 = vsub.f32 %v1710_v17, %v546_v8  ;;  %v501_v27 = vpop.xlane.xlu1 %500  ;;  %v2061_v15 = vsub.f32 %v1717_v25, %v546_v8 }
  0xed   : > { %v2064_v28 = vsub.f32 %v1723_v32, %v546_v8  ;;  %v2067_v38 = vsub.f32 %v1737_v46, %v546_v8  ;;  %v649_v13 = vmul.f32 %v2036_v12, %v2036_v12  ;;  %v550_v11 = vmul.f32 0.0013020834, %v501_v27 }
  0xee   : > { %v704_v42 = vadd.f32 %v703_v55, %v633_v21  ;;  %v635_v14 = vmul.f32 %v2052_v34, %v2052_v34  ;;  %v636_v17 = vmul.f32 %v2055_v61, %v2055_v61  ;;  %v719_v62 = vadd.f32 %v718_v52, %v646_v53  ;;  %v494_v55 = vpop.xlane.xlu0 %493 }
  0xef   : > { %v637_v25 = vmul.f32 %v2058_v1, %v2058_v1  ;;  %v650_v32 = vmul.f32 %v2039_v30, %v2039_v30  ;;  %v651_v46 = vmul.f32 %v2042_v51, %v2042_v51  ;;  %v638_v20 = vmul.f32 %v2061_v15, %v2061_v15 }
  0xf0   : > { %v705_v56 = vadd.f32 %v704_v42, %v634_v10  ;;  %v708_v21 = vadd.f32 %v636_v17, %v635_v14  ;;  %v722_v8 = vadd.f32 %v648_v29, %v647_v2  ;;  %v639_v27 = vmul.f32 %v2064_v28, %v2064_v28 }
  0xf1   : > { %v640_v53 = vmul.f32 %v2067_v38, %v2067_v38  ;;  %v2088_v52 = vsub.f32 %v1733_v44, %v550_v11  ;;  %v2091_v30 = vsub.f32 %v1735_v45, %v550_v11  ;;  %v549_v51 = vmul.f32 0.0013020834, %v494_v55 }
  0xf2   : > { %706 = vadd.xlane.f32.xlu0 %v705_v56  ;;  %v709_v10 = vadd.f32 %v708_v21, %v637_v25  ;;  %v723_v42 = vadd.f32 %v722_v8, %v649_v13  ;;  %v2094_v14 = vsub.f32 %v1740_v48, %v550_v11  ;;  %v2097_v2 = vsub.f32 %v1747_v58, %v550_v11  ;;  %v515_v13 = vpop.xlane.xlu1 %514 }
  0xf3   : > { %2812 = vst [vmem:[#allocation38_spill] sm:$0xff] %v2088_v52  ;;  %2813 = vst [vmem:[#allocation39_spill] sm:$0xff] %v2091_v30  ;;  %v2100_v29 = vsub.f32 %v1753_v63, %v550_v11  ;;  %v2103_v17 = vsub.f32 %v1767_v19, %v550_v11  ;;  %v659_v44 = vmul.f32 %v2088_v52, %v2088_v52 }
  0xf4   : > { %2814 = vst [vmem:[#allocation40_spill] sm:$0xff] %v2094_v14  ;;  %2815 = vst [vmem:[#allocation41_spill] sm:$0xff] %v2097_v2  ;;  %v710_v45 = vadd.f32 %v709_v10, %v638_v20  ;;  %v724_v55 = vadd.f32 %v723_v42, %v650_v32  ;;  %v2108_v25 = vsub.f32 %v1763_v9, %v549_v51 }
  0xf5   : > { %2816 = vst [vmem:[#allocation42_spill] sm:$0xff] %v2100_v29  ;;  %2817 = vst [vmem:[#allocation43_spill] sm:$0xff] %v2103_v17  ;;  %v2111_v48 = vsub.f32 %v1765_v16, %v549_v51  ;;  %v2114_v58 = vsub.f32 %v1770_v22, %v549_v51  ;;  %v2117_v63 = vsub.f32 %v1777_v33, %v549_v51  ;;  %v552_v22 = vmul.f32 0.0013020834, %v515_v13 }
  0xf6   : > { %v2120_v19 = vsub.f32 %v1783_v39, %v549_v51  ;;  %v660_v11 = vmul.f32 %v2091_v30, %v2091_v30  ;;  %720 = vadd.xlane.f32.xlu0 %v719_v62  ;;  %v711_v32 = vadd.f32 %v710_v45, %v639_v27  ;;  %v725_v9 = vadd.f32 %v724_v55, %v651_v46  ;;  %v2820_v30 = vld [vmem:[#allocation8_spill] sm:$0xff] }
  0xf7   : > { %v2125_v56 = vsub.f32 %v1797_v60, %v549_v51  ;;  %v653_v16 = vmul.f32 %v2108_v25, %v2108_v25  ;;  %v654_v33 = vmul.f32 %v2111_v48, %v2111_v48  ;;  %v655_v39 = vmul.f32 %v2114_v58, %v2114_v58  ;;  %v508_v51 = vpop.xlane.xlu0 %507 }
  0xf8   : > { %2818 = vst [vmem:[#allocation44_spill] sm:$0xff] %v2120_v19  ;;  %v661_v20 = vmul.f32 %v2094_v14, %v2094_v14  ;;  %v712_v21 = vadd.f32 %v711_v32, %v640_v53  ;;  %v652_v62 = vmul.f32 %v2045_v31, %v2045_v31  ;;  %v656_v60 = vmul.f32 %v2117_v63, %v2117_v63 }
  0xf9   : > { %2819 = vst [vmem:[#allocation45_spill] sm:$0xff] %v2125_v56  ;;  %v657_v46 = vmul.f32 %v2120_v19, %v2120_v19  ;;  %v729_v8 = vadd.f32 %v654_v33, %v653_v16  ;;  %v662_v27 = vmul.f32 %v2097_v2, %v2097_v2  ;;  %v736_v10 = vadd.f32 %v660_v11, %v659_v44  ;;  %v2821_v33 = vld [vmem:[#allocation13_spill] sm:$0xff]  ;;  %v2823_v44 = vld [vmem:[#allocation14_spill] sm:$0xff] }
  0xfa   : > { %v551_v42 = vmul.f32 0.0013020834, %v508_v51  ;;  %713 = vadd.xlane.f32.xlu1 %v712_v21  ;;  %v726_v45 = vadd.f32 %v725_v9, %v652_v62  ;;  %v658_v53 = vmul.f32 %v2125_v56, %v2125_v56  ;;  %v663_v55 = vmul.f32 %v2100_v29, %v2100_v29  ;;  %v2825_v9 = vld [vmem:[#allocation16_spill] sm:$0xff]  ;;  %v2827_v62 = vld [vmem:[#allocation17_spill] sm:$0xff] }
  0xfb   : > { %v730_v13 = vadd.f32 %v729_v8, %v655_v39  ;;  %v664_v32 = vmul.f32 %v2103_v17, %v2103_v17  ;;  %v737_v14 = vadd.f32 %v736_v10, %v661_v20  ;;  %v2150_v16 = vsub.f32 %v2820_v30, %v552_v22  ;;  %v2828_v29 = vld [vmem:[#allocation9_spill] sm:$0xff]  ;;  %v2830_v20 = vld [vmem:[#allocation10_spill] sm:$0xff] }
  0xfc   : > { %v2153_v2 = vsub.f32 %v2821_v33, %v551_v42  ;;  %v2156_v11 = vsub.f32 %v2823_v44, %v551_v42  ;;  %v2159_v21 = vsub.f32 %v2825_v9, %v551_v42  ;;  %v2162_v51 = vsub.f32 %v2827_v62, %v551_v42  ;;  %v2832_v10 = vld [vmem:[#allocation18_spill] sm:$0xff] }
  0xfd   : > { %v731_v39 = vadd.f32 %v730_v13, %v656_v60  ;;  %v738_v8 = vadd.f32 %v737_v14, %v662_v27  ;;  %v2165_v17 = vsub.f32 %v2828_v29, %v552_v22  ;;  %v2168_v30 = vsub.f32 %v2830_v20, %v552_v22  ;;  %v529_v14 = vpop.xlane.xlu1 %528  ;;  %v2833_v13 = vld [vmem:[#allocation11_spill] sm:$0xff]  ;;  %v2835_v20 = vld [vmem:[#allocation12_spill] sm:$0xff] }
  0xfe   : > { %2822 = vst [vmem:[#allocation8_spill] sm:$0xff] %v2153_v2  ;;  %2824 = vst [vmem:[#allocation13_spill] sm:$0xff] %v2156_v11  ;;  %727 = vadd.xlane.f32.xlu1 %v726_v45  ;;  %v2171_v33 = vsub.f32 %v2832_v10, %v551_v42  ;;  %v665_v44 = vmul.f32 %v2153_v2, %v2153_v2  ;;  %v666_v9 = vmul.f32 %v2156_v11, %v2156_v11  ;;  %v2837_v10 = vld [vmem:[#allocation21_spill] sm:$0xff] }
  0xff   : > { %2826 = vst [vmem:[#allocation14_spill] sm:$0xff] %v2159_v21  ;;  %2829 = vst [vmem:[#allocation16_spill] sm:$0xff] %v2165_v17  ;;  %v667_v60 = vmul.f32 %v2159_v21, %v2159_v21  ;;  %v732_v27 = vadd.f32 %v731_v39, %v657_v46  ;;  %v739_v29 = vadd.f32 %v738_v8, %v663_v55  ;;  %v522_v21 = vpop.xlane.xlu0 %521  ;;  %v554_v8 = vmul.f32 0.0013020834, %v529_v14 }
 0x100   : > { %2831 = vst [vmem:[#allocation17_spill] sm:$0xff] %v2168_v30  ;;  %v2180_v62 = vsub.f32 %v2833_v13, %v552_v22  ;;  %v2183_v45 = vsub.f32 %v2835_v20, %v552_v22  ;;  %v2186_v52 = vsub.f32 %v2837_v10, %v551_v42  ;;  %v668_v2 = vmul.f32 %v2162_v51, %v2162_v51 }
 0x101   : > { %v743_v56 = vadd.f32 %v666_v9, %v665_v44  ;;  %v671_v11 = vmul.f32 %v2150_v16, %v2150_v16  ;;  %v733_v19 = vadd.f32 %v732_v27, %v658_v53  ;;  %v740_v46 = vadd.f32 %v739_v29, %v664_v32  ;;  %v2838_v44 = vld [vmem:[#allocation15_spill] sm:$0xff]  ;;  %v2840_v29 = vld [vmem:[#allocation25_spill] sm:$0xff] }
 0x102   : > { %2834 = vst [vmem:[#allocation9_spill] sm:$0xff] %v2180_v62  ;;  %2836 = vst [vmem:[#allocation10_spill] sm:$0xff] %v2183_v45  ;;  %v672_v55 = vmul.f32 %v2165_v17, %v2165_v17  ;;  %v673_v39 = vmul.f32 %v2168_v30, %v2168_v30  ;;  %v553_v13 = vmul.f32 0.0013020834, %v522_v21  ;;  %v669_v42 = vmul.f32 %v2171_v33, %v2171_v33  ;;  %v2842_v30 = vld [vmem:[#allocation26_spill] sm:$0xff]  ;;  %v2844_v21 = vld [vmem:[#allocation28_spill] sm:$0xff] }
 0x103   : > { %v744_v20 = vadd.f32 %v743_v56, %v667_v60  ;;  %734 = vadd.xlane.f32.xlu0 %v733_v19  ;;  %741 = vadd.xlane.f32.xlu1 %v740_v46  ;;  %v2199_v9 = vsub.f32 %v2838_v44, %v552_v22  ;;  %v674_v53 = vmul.f32 %v2180_v62, %v2180_v62  ;;  %v2846_v60 = vld [vmem:[#allocation29_spill] sm:$0xff]  ;;  %v543_v44 = vpop.xlane.xlu1 %542 }
 0x104   : > { %v750_v32 = vadd.f32 %v672_v55, %v671_v11  ;;  %v2204_v10 = vsub.f32 %v2840_v29, %v553_v13  ;;  %v2207_v14 = vsub.f32 %v2842_v30, %v553_v13  ;;  %v2210_v17 = vsub.f32 %v2844_v21, %v553_v13  ;;  %v2848_v55 = vld [vmem:[#allocation19_spill] sm:$0xff] }
 0x105   : > { %2839 = vst [vmem:[#allocation18_spill] sm:$0xff] %v2199_v9  ;;  %v745_v27 = vadd.f32 %v744_v20, %v668_v2  ;;  %v670_v19 = vmul.f32 %v2186_v52, %v2186_v52  ;;  %v675_v56 = vmul.f32 %v2183_v45, %v2183_v45  ;;  %v2217_v46 = vsub.f32 %v2846_v60, %v553_v13 }
 0x106   : > { %2841 = vst [vmem:[#allocation11_spill] sm:$0xff] %v2204_v10  ;;  %2843 = vst [vmem:[#allocation12_spill] sm:$0xff] %v2207_v14  ;;  %v751_v22 = vadd.f32 %v750_v32, %v673_v39  ;;  %v677_v11 = vmul.f32 %v2204_v10, %v2204_v10  ;;  %v678_v30 = vmul.f32 %v2207_v14, %v2207_v14  ;;  %v2849_v14 = vld [vmem:[#allocation20_spill] sm:$0xff] }
 0x107   : > { %2845 = vst [vmem:[#allocation21_spill] sm:$0xff] %v2210_v17  ;;  %2847 = vst [vmem:[#allocation15_spill] sm:$0xff] %v2217_v46  ;;  %v746_v2 = vadd.f32 %v745_v27, %v669_v42  ;;  %v2224_v20 = vsub.f32 %v2848_v55, %v554_v8  ;;  %v676_v29 = vmul.f32 %v2199_v9, %v2199_v9  ;;  %v536_v55 = vpop.xlane.xlu0 %535 }
 0x108   : > { %v752_v21 = vadd.f32 %v751_v22, %v674_v53  ;;  %v2229_v39 = vsub.f32 %v1903_v43, %v553_v13  ;;  %v679_v42 = vmul.f32 %v2210_v17, %v2210_v17  ;;  %v680_v27 = vmul.f32 %v2217_v46, %v2217_v46  ;;  %v2850_v53 = vld [vmem:[#allocation22_spill] sm:$0xff]  ;;  %v2851_v43 = vld [vmem:[#allocation23_spill] sm:$0xff] }
 0x109   : > { %v747_v32 = vadd.f32 %v746_v2, %v670_v19  ;;  %v757_v60 = vadd.f32 %v678_v30, %v677_v11  ;;  %v2236_v10 = vsub.f32 %v2849_v14, %v554_v8  ;;  %v2239_v62 = vsub.f32 %v1917_v23, %v553_v13  ;;  %v2852_v30 = vld [vmem:[#allocation24_spill] sm:$0xff] }
 0x10a   : > { %v753_v45 = vadd.f32 %v752_v21, %v675_v56  ;;  %v2242_v22 = vsub.f32 %v2850_v53, %v554_v8  ;;  %v2245_v9 = vsub.f32 %v2851_v43, %v554_v8  ;;  %v556_v17 = vmul.f32 0.0013020834, %v543_v44  ;;  %v2854_v53 = vld [vmem:[#allocation27_spill] sm:$0xff] }
 0x10b   : > { %v555_v19 = vmul.f32 0.0013020834, %v536_v55  ;;  %748 = vadd.xlane.f32.xlu0 %v747_v32  ;;  %v758_v2 = vadd.f32 %v757_v60, %v679_v42  ;;  %v683_v11 = vmul.f32 %v2224_v20, %v2224_v20  ;;  %v2250_v46 = vsub.f32 %v2852_v30, %v554_v8  ;;  %v2856_v30 = vld [vmem:[#allocation30_spill] sm:$0xff] }
 0x10c   : > { %v754_v14 = vadd.f32 %v753_v45, %v676_v29  ;;  %v684_v23 = vmul.f32 %v2236_v10, %v2236_v10  ;;  %v685_v13 = vmul.f32 %v2242_v22, %v2242_v22  ;;  %v681_v56 = vmul.f32 %v2229_v39, %v2229_v39 }
 0x10d   : > { %v759_v44 = vadd.f32 %v758_v2, %v680_v27  ;;  %v686_v21 = vmul.f32 %v2245_v9, %v2245_v9  ;;  %v2261_v42 = vsub.f32 %v1941_v40, %v555_v19  ;;  %v2264_v29 = vsub.f32 %v1943_v36, %v555_v19 }
 0x10e   : > { %755 = vadd.xlane.f32.xlu1 %v754_v14  ;;  %v764_v45 = vadd.f32 %v684_v23, %v683_v11  ;;  %v2267_v32 = vsub.f32 %v1949_v6, %v555_v19  ;;  %v2270_v60 = vsub.f32 %v1953_v0, %v555_v19  ;;  %v682_v27 = vmul.f32 %v2239_v62, %v2239_v62 }
 0x10f   : > { %v760_v55 = vadd.f32 %v759_v44, %v681_v56  ;;  %v2275_v43 = vsub.f32 %v2854_v53, %v554_v8  ;;  %v689_v40 = vmul.f32 %v2261_v42, %v2261_v42  ;;  %v687_v36 = vmul.f32 %v2250_v46, %v2250_v46  ;;  %v2858_v53 = vld [vmem:[#allocation31_spill] sm:$0xff] }
 0x110   : > { %2853 = vst [vmem:[#allocation25_spill] sm:$0xff] %v2270_v60  ;;  %v765_v2 = vadd.f32 %v764_v45, %v685_v13  ;;  %v690_v6 = vmul.f32 %v2264_v29, %v2264_v29  ;;  %v691_v0 = vmul.f32 %v2267_v32, %v2267_v32  ;;  %v2286_v14 = vsub.f32 %v1960_v59, %v555_v19 }
 0x111   : > { %v761_v11 = vadd.f32 %v760_v55, %v682_v27  ;;  %v692_v8 = vmul.f32 %v2270_v60, %v2270_v60  ;;  %v2291_v23 = vsub.f32 %v2856_v30, %v556_v17  ;;  %v2294_v13 = vsub.f32 %v2858_v53, %v556_v17 }
 0x112   : > { %2855 = vst [vmem:[#allocation26_spill] sm:$0xff] %v2286_v14  ;;  %v766_v56 = vadd.f32 %v765_v2, %v686_v21  ;;  %v771_v44 = vadd.f32 %v690_v6, %v689_v40  ;;  %v2297_v45 = vsub.f32 %v1920_v5, %v556_v17  ;;  %v688_v27 = vmul.f32 %v2275_v43, %v2275_v43 }
 0x113   : > { %2857 = vst [vmem:[#allocation28_spill] sm:$0xff] %v2291_v23  ;;  %2859 = vst [vmem:[#allocation29_spill] sm:$0xff] %v2294_v13  ;;  %762 = vadd.xlane.f32.xlu0 %v761_v11  ;;  %v2302_v59 = vsub.f32 %v1964_v26, %v555_v19  ;;  %v2305_v55 = vsub.f32 %v1927_v54, %v556_v17  ;;  %v695_v21 = vmul.f32 %v2291_v23, %v2291_v23 }
 0x114   : > { %2860 = vst [vmem:[#allocation19_spill] sm:$0xff] %v2297_v45  ;;  %v767_v40 = vadd.f32 %v766_v56, %v687_v36  ;;  %v772_v2 = vadd.f32 %v771_v44, %v691_v0  ;;  %v696_v6 = vmul.f32 %v2294_v13, %v2294_v13  ;;  %v697_v5 = vmul.f32 %v2297_v45, %v2297_v45 }
 0x115   : > { %2861 = vst [vmem:[#allocation20_spill] sm:$0xff] %v2302_v59  ;;  %2862 = vst [vmem:[#allocation22_spill] sm:$0xff] %v2305_v55  ;;  %v693_v11 = vmul.f32 %v2286_v14, %v2286_v14  ;;  %v2316_v26 = vsub.f32 %v1933_v50, %v556_v17  ;;  %v698_v30 = vmul.f32 %v2305_v55, %v2305_v55 }
 0x116   : > { %v768_v19 = vadd.f32 %v767_v40, %v688_v27  ;;  %v773_v54 = vadd.f32 %v772_v2, %v692_v8  ;;  %v778_v53 = vadd.f32 %v696_v6, %v695_v21  ;;  %v694_v36 = vmul.f32 %v2302_v59, %v2302_v59 }
 0x117   : > { %2863 = vst [vmem:[#allocation23_spill] sm:$0xff] %v2316_v26  ;;  %v2323_v56 = vsub.f32 %v1945_v37, %v556_v17  ;;  %v699_v50 = vmul.f32 %v2316_v26, %v2316_v26  ;;  %v896_v40 = vlaneseq }
 0x118   : > { %769 = vadd.xlane.f32.xlu1 %v768_v19  ;;  %v774_v0 = vadd.f32 %v773_v54, %v693_v11  ;;  %v779_v44 = vadd.f32 %v778_v53, %v697_v5 }
 0x119   : > { %2864 = vst [vmem:[#allocation24_spill] sm:$0xff] %v2323_v56  ;;  %v700_v8 = vmul.f32 %v2323_v56, %v2323_v56  ;;  %v897_v19 = vshrl.u32 %v896_v40, 7 }
 0x11a   : > { %v775_v45 = vadd.f32 %v774_v0, %v694_v36  ;;  %v780_v13 = vadd.f32 %v779_v44, %v698_v30 }
 0x11b   : > { %v898_v54 = vsub.s32 0, %v897_v19  ;;  %v902_v53 = vsub.s32 1, %v897_v19  ;;  %v906_v30 = vsub.s32 2, %v897_v19  ;;  %v914_v44 = vsub.s32 4, %v897_v19 }
 0x11c   : > { %776 = vadd.xlane.f32.xlu0 %v775_v45  ;;  %v781_v27 = vadd.f32 %v780_v13, %v699_v50  ;;  %v821_v45 = vld [vmem:[%s2714_s2] sm:$0x3f]  ;;  %v910_v13 = vsub.s32 3, %v897_v19  ;;  %v918_v50 = vsub.s32 5, %v897_v19 }
 0x11d   : > { %v2337_v40 = vrot.slane %v821_v45, %v902_v53 }
 0x11e   : > { %v782_v21 = vadd.f32 %v781_v27, %v700_v8  ;;  %v822_v8 = vld [vmem:[%s2715_s3] sm:$0x3f] }
 0x11f   : > { %v2347_v19 = vrot.slane %v822_v8, %v898_v54  ;;  %v2351_v56 = vrot.slane %v822_v8, %v906_v30  ;;  %v2353_v26 = vrot.slane %v822_v8, %v910_v13  ;;  %v2355_v55 = vrot.slane %v822_v8, %v914_v44 }
 0x120   : > { %783 = vadd.xlane.f32.xlu1 %v782_v21  ;;  %v2335_v21 = vrot.slane %v821_v45, %v898_v54  ;;  %v2361_v54 = vrot.slane %v822_v8, %v918_v50 }
 0x17f   : > { %v707_v2 = vpop.xlane.xlu0 %706 }
 0x180   : > { %v785_v6 = vmul.f32 0.0013020834, %v707_v2 }
 0x182   : > { %v797_v11 = vadd.f32 1e-05, %v785_v6  ;;  %v2339_v6 = vrot.slane %v821_v45, %v906_v30 }
 0x183   : > { %v721_v37 = vpop.xlane.xlu0 %720 }
 0x184   : > { %1339 = vrsqrt.f32 %v797_v11  ;;  %v787_v17 = vmul.f32 0.0013020834, %v721_v37  ;;  %v2341_v11 = vrot.slane %v821_v45, %v910_v13 }
 0x186   : > { %v799_v5 = vadd.f32 1e-05, %v787_v17  ;;  %v2343_v17 = vrot.slane %v821_v45, %v914_v44 }
 0x187   : > { %v714_v36 = vpop.xlane.xlu1 %713 }
 0x188   : > { %v786_v0 = vmul.f32 0.0013020834, %v714_v36  ;;  %1341 = vrsqrt.f32 %v799_v5  ;;  %v2345_v5 = vrot.slane %v821_v45, %v918_v50  ;;  %v2349_v36 = vrot.slane %v822_v8, %v902_v53 }
 0x18a   : > { %v798_v27 = vadd.f32 1e-05, %v786_v0 }
 0x18b   : > { %v728_v2 = vpop.xlane.xlu1 %727 }
 0x18c   : > { %1343 = vrsqrt.f32 %v798_v27  ;;  %v788_v37 = vmul.f32 0.0013020834, %v728_v2 }
 0x18e   : > { %v1340_v0 = vpop.eup %1339  ;;  %v800_v23 = vadd.f32 1e-05, %v788_v37 }
 0x18f   : > { %v823_v59 = vmul.f32 %v1340_v0, %v1994_v3  ;;  %v824_v27 = vmul.f32 %v1340_v0, %v1997_v18  ;;  %v825_v2 = vmul.f32 %v1340_v0, %v2000_v41  ;;  %v826_v45 = vmul.f32 %v1340_v0, %v2003_v49 }
 0x190   : > { %v827_v53 = vmul.f32 %v1340_v0, %v2006_v47  ;;  %v828_v30 = vmul.f32 %v1340_v0, %v2009_v35  ;;  %1345 = vrsqrt.f32 %v800_v23  ;;  %v735_v13 = vpop.xlane.xlu0 %734  ;;  %v742_v14 = vpop.xlane.xlu1 %741 }
 0x191   : > { %v926_v44 = vmul.f32 %v2335_v21, %v823_v59  ;;  %v927_v37 = vmul.f32 %v2337_v40, %v824_v27  ;;  %v928_v3 = vmul.f32 %v2339_v6, %v825_v2  ;;  %v929_v18 = vmul.f32 %v2341_v11, %v826_v45 }
 0x192   : > { %v1342_v41 = vpop.eup %1341  ;;  %v930_v49 = vmul.f32 %v2343_v17, %v827_v53  ;;  %v931_v50 = vmul.f32 %v2345_v5, %v828_v30  ;;  %v789_v47 = vmul.f32 0.0013020834, %v735_v13  ;;  %v790_v8 = vmul.f32 0.0013020834, %v742_v14  ;;  %v2865_v14 = vld [vmem:[#allocation32_spill] sm:$0xff]  ;;  %v2866_v13 = vld [vmem:[#allocation33_spill] sm:$0xff] }
 0x193   : > { %v1029_v35 = vadd.f32 %v2347_v19, %v926_v44  ;;  %v1030_v23 = vadd.f32 %v2349_v36, %v927_v37  ;;  %v1031_v59 = vadd.f32 %v2351_v56, %v928_v3  ;;  %v1032_v0 = vadd.f32 %v2353_v26, %v929_v18 }
 0x194   : > { %v1033_v27 = vadd.f32 %v2355_v55, %v930_v49  ;;  %v1034_v2 = vadd.f32 %v2361_v54, %v931_v50  ;;  %v835_v45 = vmul.f32 %v1342_v41, %v1970_v57  ;;  %v836_v53 = vmul.f32 %v1342_v41, %v1973_v7  ;;  %v2867_v57 = vld [vmem:[#allocation34_spill] sm:$0xff]  ;;  %v2868_v7 = vld [vmem:[#allocation35_spill] sm:$0xff] }
 0x195   : > { %1101 = vst [vmem:[%s2381_s30] sm:$0xff] %v1029_v35  ;;  %1102 = vst [vmem:[%s2381_s30 + $0x8] sm:$0xff] %v1030_v23  ;;  %v837_v30 = vmul.f32 %v1342_v41, %v2865_v14  ;;  %v838_v44 = vmul.f32 %v1342_v41, %v2866_v13  ;;  %v839_v37 = vmul.f32 %v1342_v41, %v2867_v57  ;;  %v801_v60 = vadd.f32 1e-05, %v789_v47 }
 0x196   : > { %1103 = vst [vmem:[%s2381_s30 + $0x10] sm:$0xff] %v1031_v59  ;;  %1104 = vst [vmem:[%s2381_s30 + $0x18] sm:$0xff] %v1032_v0  ;;  %v840_v3 = vmul.f32 %v1342_v41, %v2868_v7  ;;  %v1344_v18 = vpop.eup %1343  ;;  %v938_v49 = vmul.f32 %v2335_v21, %v835_v45  ;;  %v939_v50 = vmul.f32 %v2337_v40, %v836_v53  ;;  %v802_v35 = vadd.f32 1e-05, %v790_v8 }
 0x197   : > { %1105 = vst [vmem:[%s2381_s30 + $0x20] sm:$0xff] %v1033_v27  ;;  %1106 = vst [vmem:[%s2381_s30 + $0x28] sm:$0xff] %v1034_v2  ;;  %v829_v23 = vmul.f32 %v1344_v18, %v2052_v34  ;;  %v830_v59 = vmul.f32 %v1344_v18, %v2055_v61  ;;  %v831_v0 = vmul.f32 %v1344_v18, %v2058_v1  ;;  %1347 = vrsqrt.f32 %v801_v60 }
 0x198   : > { %v832_v14 = vmul.f32 %v1344_v18, %v2061_v15  ;;  %v833_v13 = vmul.f32 %v1344_v18, %v2064_v28  ;;  %v834_v41 = vmul.f32 %v1344_v18, %v2067_v38  ;;  %v940_v27 = vmul.f32 %v2339_v6, %v837_v30  ;;  %v749_v7 = vpop.xlane.xlu0 %748 }
 0x199   : > { %v941_v2 = vmul.f32 %v2341_v11, %v838_v44  ;;  %v932_v45 = vmul.f32 %v2335_v21, %v829_v23  ;;  %v933_v47 = vmul.f32 %v2337_v40, %v830_v59  ;;  %v934_v34 = vmul.f32 %v2339_v6, %v831_v0 }
 0x19a   : > { %v935_v61 = vmul.f32 %v2341_v11, %v832_v14  ;;  %v1346_v1 = vpop.eup %1345  ;;  %v936_v15 = vmul.f32 %v2343_v17, %v833_v13  ;;  %v937_v28 = vmul.f32 %v2345_v5, %v834_v41  ;;  %v942_v38 = vmul.f32 %v2343_v17, %v839_v37 }
 0x19b   : > { %v943_v8 = vmul.f32 %v2345_v5, %v840_v3  ;;  %v1035_v53 = vadd.f32 %v2347_v19, %v932_v45  ;;  %v1036_v30 = vadd.f32 %v2349_v36, %v933_v47  ;;  %v1037_v44 = vadd.f32 %v2351_v56, %v934_v34  ;;  %v2869_v45 = vld [vmem:[#allocation36_spill] sm:$0xff] }
 0x19c   : > { %v1038_v57 = vadd.f32 %v2353_v26, %v935_v61  ;;  %v1039_v18 = vadd.f32 %v2355_v55, %v936_v15  ;;  %v1040_v23 = vadd.f32 %v2361_v54, %v937_v28  ;;  %v1041_v37 = vadd.f32 %v2347_v19, %v938_v49 }
 0x19d   : > { %v1042_v3 = vadd.f32 %v2349_v36, %v939_v50  ;;  %1107 = vst [vmem:[%s2381_s30 + $0x30] sm:$0xff] %v1035_v53  ;;  %1108 = vst [vmem:[%s2381_s30 + $0x38] sm:$0xff] %v1036_v30  ;;  %v1043_v59 = vadd.f32 %v2351_v56, %v940_v27  ;;  %v1044_v0 = vadd.f32 %v2353_v26, %v941_v2  ;;  %v756_v27 = vpop.xlane.xlu1 %755  ;;  %v2870_v2 = vld [vmem:[#allocation37_spill] sm:$0xff]  ;;  %v791_v15 = vmul.f32 0.0013020834, %v749_v7 }
 0x19e   : > { %1109 = vst [vmem:[%s2381_s30 + $0x40] sm:$0xff] %v1037_v44  ;;  %1110 = vst [vmem:[%s2381_s30 + $0x48] sm:$0xff] %v1038_v57  ;;  %v1045_v14 = vadd.f32 %v2355_v55, %v942_v38  ;;  %v1046_v13 = vadd.f32 %v2361_v54, %v943_v8  ;;  %v841_v49 = vmul.f32 %v1346_v1, %v2026_v24  ;;  %1349 = vrsqrt.f32 %v802_v35 }
 0x19f   : > { %1111 = vst [vmem:[%s2381_s30 + $0x50] sm:$0xff] %v1039_v18  ;;  %1112 = vst [vmem:[%s2381_s30 + $0x58] sm:$0xff] %v1040_v23  ;;  %v842_v50 = vmul.f32 %v1346_v1, %v2029_v4  ;;  %v843_v41 = vmul.f32 %v1346_v1, %v2036_v12  ;;  %v844_v47 = vmul.f32 %v1346_v1, %v2869_v45  ;;  %v792_v18 = vmul.f32 0.0013020834, %v756_v27 }
 0x1a0   : > { %1113 = vst [vmem:[%s2381_s30 + $0x60] sm:$0xff] %v1041_v37  ;;  %1114 = vst [vmem:[%s2381_s30 + $0x68] sm:$0xff] %v1042_v3  ;;  %v845_v34 = vmul.f32 %v1346_v1, %v2870_v2  ;;  %v846_v61 = vmul.f32 %v1346_v1, %v2045_v31  ;;  %v944_v28 = vmul.f32 %v2335_v21, %v841_v49  ;;  %v803_v31 = vadd.f32 1e-05, %v791_v15  ;;  %v763_v60 = vpop.xlane.xlu0 %762  ;;  %v2871_v2 = vld [vmem:[#allocation44_spill] sm:$0xff] }
 0x1a1   : > { %1115 = vst [vmem:[%s2381_s30 + $0x70] sm:$0xff] %v1043_v59  ;;  %1116 = vst [vmem:[%s2381_s30 + $0x78] sm:$0xff] %v1044_v0  ;;  %v945_v24 = vmul.f32 %v2337_v40, %v842_v50  ;;  %v946_v4 = vmul.f32 %v2339_v6, %v843_v41  ;;  %v947_v12 = vmul.f32 %v2341_v11, %v844_v47  ;;  %v793_v35 = vmul.f32 0.0013020834, %v763_v60 }
 0x1a2   : > { %1117 = vst [vmem:[%s2381_s30 + $0x80] sm:$0xff] %v1045_v14  ;;  %1118 = vst [vmem:[%s2381_s30 + $0x88] sm:$0xff] %v1046_v13  ;;  %v948_v38 = vmul.f32 %v2343_v17, %v845_v34  ;;  %v949_v8 = vmul.f32 %v2345_v5, %v846_v61  ;;  %v1047_v1 = vadd.f32 %v2347_v19, %v944_v28  ;;  %1351 = vrsqrt.f32 %v803_v31  ;;  %v1348_v13 = vpop.eup %1347  ;;  %v2872_v61 = vld [vmem:[#allocation45_spill] sm:$0xff] }
 0x1a3   : > { %v1048_v53 = vadd.f32 %v2349_v36, %v945_v24  ;;  %v1049_v30 = vadd.f32 %v2351_v56, %v946_v4  ;;  %v1050_v44 = vadd.f32 %v2353_v26, %v947_v12  ;;  %v804_v37 = vadd.f32 1e-05, %v792_v18  ;;  %v2873_v12 = vld [vmem:[#allocation38_spill] sm:$0xff]  ;;  %v2875_v18 = vld [vmem:[#allocation40_spill] sm:$0xff] }
 0x1a4   : > { %v1051_v57 = vadd.f32 %v2355_v55, %v948_v38  ;;  %v1052_v7 = vadd.f32 %v2361_v54, %v949_v8  ;;  %1119 = vst [vmem:[%s2381_s30 + $0x90] sm:$0xff] %v1047_v1  ;;  %v805_v59 = vadd.f32 1e-05, %v793_v35  ;;  %v847_v50 = vmul.f32 %v1348_v13, %v2108_v25  ;;  %v2874_v8 = vld [vmem:[#allocation39_spill] sm:$0xff] }
 0x1a5   : > { %1120 = vst [vmem:[%s2381_s30 + $0x98] sm:$0xff] %v1048_v53  ;;  %1121 = vst [vmem:[%s2381_s30 + $0xa0] sm:$0xff] %v1049_v30  ;;  %v770_v23 = vpop.xlane.xlu1 %769  ;;  %1353 = vrsqrt.f32 %v804_v37  ;;  %v848_v41 = vmul.f32 %v1348_v13, %v2111_v48  ;;  %v849_v45 = vmul.f32 %v1348_v13, %v2114_v58  ;;  %v850_v47 = vmul.f32 %v1348_v13, %v2117_v63 }
 0x1a6   : > { %1122 = vst [vmem:[%s2381_s30 + $0xa8] sm:$0xff] %v1050_v44  ;;  %1123 = vst [vmem:[%s2381_s30 + $0xb0] sm:$0xff] %v1051_v57  ;;  %v794_v3 = vmul.f32 0.0013020834, %v770_v23  ;;  %1355 = vrsqrt.f32 %v805_v59  ;;  %v851_v34 = vmul.f32 %v1348_v13, %v2871_v2  ;;  %v852_v15 = vmul.f32 %v1348_v13, %v2872_v61  ;;  %v2876_v23 = vld [vmem:[#allocation41_spill] sm:$0xff] }
 0x1a7   : > { %1124 = vst [vmem:[%s2381_s30 + $0xb8] sm:$0xff] %v1052_v7  ;;  %v950_v24 = vmul.f32 %v2335_v21, %v847_v50  ;;  %v951_v4 = vmul.f32 %v2337_v40, %v848_v41  ;;  %v952_v25 = vmul.f32 %v2339_v6, %v849_v45  ;;  %v953_v48 = vmul.f32 %v2341_v11, %v850_v47  ;;  %v2879_v45 = vld [vmem:[#allocation8_spill] sm:$0xff]  ;;  %v2880_v2 = vld [vmem:[#allocation13_spill] sm:$0xff] }
 0x1a8   : > { %v806_v0 = vadd.f32 1e-05, %v794_v3  ;;  %v1350_v27 = vpop.eup %1349  ;;  %v954_v58 = vmul.f32 %v2343_v17, %v851_v34  ;;  %v955_v63 = vmul.f32 %v2345_v5, %v852_v15  ;;  %v2877_v3 = vld [vmem:[#allocation42_spill] sm:$0xff] }
 0x1a9   : > { %v777_v14 = vpop.xlane.xlu0 %776  ;;  %v853_v38 = vmul.f32 %v1350_v27, %v2873_v12  ;;  %v854_v31 = vmul.f32 %v1350_v27, %v2874_v8  ;;  %v1053_v1 = vadd.f32 %v2347_v19, %v950_v24  ;;  %v1054_v53 = vadd.f32 %v2349_v36, %v951_v4 }
 0x1aa   : > { %v795_v49 = vmul.f32 0.0013020834, %v777_v14  ;;  %1357 = vrsqrt.f32 %v806_v0  ;;  %v1055_v30 = vadd.f32 %v2351_v56, %v952_v25  ;;  %v1056_v44 = vadd.f32 %v2353_v26, %v953_v48  ;;  %v2878_v0 = vld [vmem:[#allocation43_spill] sm:$0xff] }
 0x1ab   : > { %v1057_v57 = vadd.f32 %v2355_v55, %v954_v58  ;;  %v1058_v7 = vadd.f32 %v2361_v54, %v955_v63  ;;  %v855_v35 = vmul.f32 %v1350_v27, %v2875_v18  ;;  %v856_v37 = vmul.f32 %v1350_v27, %v2876_v23  ;;  %1125 = vst [vmem:[%s2381_s30 + $0xc0] sm:$0xff] %v1053_v1  ;;  %v2881_v63 = vld [vmem:[#allocation14_spill] sm:$0xff]  ;;  %v2882_v18 = vld [vmem:[#allocation16_spill] sm:$0xff] }
 0x1ac   : > { %v2465_v28 = vadd.f32 1e-05, %v795_v49  ;;  %v1352_v60 = vpop.eup %1351  ;;  %1126 = vst [vmem:[%s2381_s30 + $0xc8] sm:$0xff] %v1054_v53  ;;  %1127 = vst [vmem:[%s2381_s30 + $0xd0] sm:$0xff] %v1055_v30  ;;  %v857_v59 = vmul.f32 %v1350_v27, %v2877_v3  ;;  %v858_v14 = vmul.f32 %v1350_v27, %v2878_v0  ;;  %v956_v13 = vmul.f32 %v2335_v21, %v853_v38 }
 0x1ad   : > { %1128 = vst [vmem:[%s2381_s30 + $0xd8] sm:$0xff] %v1056_v44  ;;  %v957_v49 = vmul.f32 %v2337_v40, %v854_v31  ;;  %1129 = vst [vmem:[%s2381_s30 + $0xe0] sm:$0xff] %v1057_v57  ;;  %v958_v50 = vmul.f32 %v2339_v6, %v855_v35  ;;  %v959_v41 = vmul.f32 %v2341_v11, %v856_v37 }
 0x1ae   : > { %1130 = vst [vmem:[%s2381_s30 + $0xe8] sm:$0xff] %v1058_v7  ;;  %v859_v47 = vmul.f32 %v1352_v60, %v2879_v45  ;;  %v860_v34 = vmul.f32 %v1352_v60, %v2880_v2  ;;  %v960_v15 = vmul.f32 %v2343_v17, %v857_v59  ;;  %v961_v27 = vmul.f32 %v2345_v5, %v858_v14 }
 0x1af   : > { %v1354_v61 = vpop.eup %1353  ;;  %v1059_v24 = vadd.f32 %v2347_v19, %v956_v13  ;;  %v1060_v4 = vadd.f32 %v2349_v36, %v957_v49  ;;  %v1061_v48 = vadd.f32 %v2351_v56, %v958_v50  ;;  %v1062_v58 = vadd.f32 %v2353_v26, %v959_v41  ;;  %v2883_v13 = vld [vmem:[#allocation17_spill] sm:$0xff]  ;;  %v2885_v41 = vld [vmem:[#allocation10_spill] sm:$0xff] }
 0x1b0   : > { %v1356_v25 = vpop.eup %1355  ;;  %v861_v12 = vmul.f32 %v1352_v60, %v2881_v63  ;;  %v862_v38 = vmul.f32 %v1352_v60, %v2162_v51  ;;  %v1063_v8 = vadd.f32 %v2355_v55, %v960_v15  ;;  %v1064_v31 = vadd.f32 %v2361_v54, %v961_v27  ;;  %v2884_v50 = vld [vmem:[#allocation9_spill] sm:$0xff] }
 0x1b1   : > { %1131 = vst [vmem:[%s2381_s30 + $0xf0] sm:$0xff] %v1059_v24  ;;  %1132 = vst [vmem:[%s2381_s30 + $0xf8] sm:$0xff] %v1060_v4  ;;  %v863_v1 = vmul.f32 %v1352_v60, %v2171_v33  ;;  %v864_v53 = vmul.f32 %v1352_v60, %v2186_v52  ;;  %v962_v44 = vmul.f32 %v2335_v21, %v859_v47  ;;  %v2886_v47 = vld [vmem:[#allocation18_spill] sm:$0xff]  ;;  %v2887_v4 = vld [vmem:[#allocation11_spill] sm:$0xff]  ;;  %1359 = vrsqrt.f32 %v2465_v28 }
 0x1b2   : > { %1133 = vst [vmem:[%s2381_s30 + $0x100] sm:$0xff] %v1061_v48  ;;  %1134 = vst [vmem:[%s2381_s30 + $0x108] sm:$0xff] %v1062_v58  ;;  %v963_v57 = vmul.f32 %v2337_v40, %v860_v34  ;;  %v964_v51 = vmul.f32 %v2339_v6, %v861_v12  ;;  %v965_v7 = vmul.f32 %v2341_v11, %v862_v38  ;;  %v2888_v58 = vld [vmem:[#allocation12_spill] sm:$0xff] }
 0x1b3   : > { %1135 = vst [vmem:[%s2381_s30 + $0x110] sm:$0xff] %v1063_v8  ;;  %1136 = vst [vmem:[%s2381_s30 + $0x118] sm:$0xff] %v1064_v31  ;;  %v966_v52 = vmul.f32 %v2343_v17, %v863_v1  ;;  %v967_v33 = vmul.f32 %v2345_v5, %v864_v53  ;;  %v865_v60 = vmul.f32 %v1354_v61, %v2150_v16  ;;  %v2889_v53 = vld [vmem:[#allocation21_spill] sm:$0xff] }
 0x1b4   : > { %v2511_v30 = vpop.eup %1357  ;;  %v866_v35 = vmul.f32 %v1354_v61, %v2882_v18  ;;  %v1065_v23 = vadd.f32 %v2347_v19, %v962_v44  ;;  %v1066_v37 = vadd.f32 %v2349_v36, %v963_v57  ;;  %v1067_v3 = vadd.f32 %v2351_v56, %v964_v51  ;;  %v2890_v57 = vld [vmem:[#allocation15_spill] sm:$0xff] }
 0x1b5   : > { %v1068_v59 = vadd.f32 %v2353_v26, %v965_v7  ;;  %v1069_v0 = vadd.f32 %v2355_v55, %v966_v52  ;;  %v1070_v14 = vadd.f32 %v2361_v54, %v967_v33  ;;  %v867_v49 = vmul.f32 %v1354_v61, %v2883_v13 }
 0x1b6   : > { %v868_v16 = vmul.f32 %v1354_v61, %v2884_v50  ;;  %1137 = vst [vmem:[%s2381_s30 + $0x120] sm:$0xff] %v1065_v23  ;;  %1138 = vst [vmem:[%s2381_s30 + $0x128] sm:$0xff] %v1066_v37  ;;  %v869_v45 = vmul.f32 %v1354_v61, %v2885_v41  ;;  %v870_v2 = vmul.f32 %v1354_v61, %v2886_v47 }
 0x1b7   : > { %1139 = vst [vmem:[%s2381_s30 + $0x130] sm:$0xff] %v1067_v3  ;;  %1140 = vst [vmem:[%s2381_s30 + $0x138] sm:$0xff] %v1068_v59  ;;  %v968_v34 = vmul.f32 %v2335_v21, %v865_v60  ;;  %v969_v15 = vmul.f32 %v2337_v40, %v866_v35  ;;  %v970_v27 = vmul.f32 %v2339_v6, %v867_v49  ;;  %v784_v49 = vpop.xlane.xlu1 %783 }
 0x1b8   : > { %1141 = vst [vmem:[%s2381_s30 + $0x140] sm:$0xff] %v1069_v0  ;;  %1142 = vst [vmem:[%s2381_s30 + $0x148] sm:$0xff] %v1070_v14  ;;  %v971_v24 = vmul.f32 %v2341_v11, %v868_v16  ;;  %v871_v48 = vmul.f32 %v1356_v25, %v2887_v4  ;;  %v872_v63 = vmul.f32 %v1356_v25, %v2888_v58 }
 0x1b9   : > { %v972_v61 = vmul.f32 %v2343_v17, %v869_v45  ;;  %v973_v12 = vmul.f32 %v2345_v5, %v870_v2  ;;  %v1071_v38 = vadd.f32 %v2347_v19, %v968_v34  ;;  %v1072_v8 = vadd.f32 %v2349_v36, %v969_v15 }
 0x1ba   : > { %v1073_v31 = vadd.f32 %v2351_v56, %v970_v27  ;;  %v1074_v1 = vadd.f32 %v2353_v26, %v971_v24  ;;  %v873_v44 = vmul.f32 %v1356_v25, %v2889_v53  ;;  %v874_v51 = vmul.f32 %v1356_v25, %v2890_v57  ;;  %v2893_v53 = vld [vmem:[#allocation20_spill] sm:$0xff] }
 0x1bb   : > { %v1075_v7 = vadd.f32 %v2355_v55, %v972_v61  ;;  %v1076_v52 = vadd.f32 %v2361_v54, %v973_v12  ;;  %1143 = vst [vmem:[%s2381_s30 + $0x150] sm:$0xff] %v1071_v38  ;;  %1144 = vst [vmem:[%s2381_s30 + $0x158] sm:$0xff] %v1072_v8  ;;  %v875_v33 = vmul.f32 %v1356_v25, %v2229_v39  ;;  %v1360_v58 = vpop.eup %1359  ;;  %v2891_v38 = vld [vmem:[#allocation25_spill] sm:$0xff] }
 0x1bc   : > { %v876_v60 = vmul.f32 %v1356_v25, %v2239_v62  ;;  %1145 = vst [vmem:[%s2381_s30 + $0x160] sm:$0xff] %v1073_v31  ;;  %1146 = vst [vmem:[%s2381_s30 + $0x168] sm:$0xff] %v1074_v1  ;;  %v974_v18 = vmul.f32 %v2335_v21, %v871_v48  ;;  %v975_v35 = vmul.f32 %v2337_v40, %v872_v63  ;;  %v2892_v31 = vld [vmem:[#allocation26_spill] sm:$0xff] }
 0x1bd   : > { %v976_v23 = vmul.f32 %v2339_v6, %v873_v44  ;;  %v977_v37 = vmul.f32 %v2341_v11, %v874_v51  ;;  %1147 = vst [vmem:[%s2381_s30 + $0x170] sm:$0xff] %v1075_v7  ;;  %1148 = vst [vmem:[%s2381_s30 + $0x178] sm:$0xff] %v1076_v52  ;;  %v978_v3 = vmul.f32 %v2343_v17, %v875_v33 }
 0x1be   : > { %v979_v62 = vmul.f32 %v2345_v5, %v876_v60  ;;  %v877_v39 = vmul.f32 %v2511_v30, %v2224_v20  ;;  %v878_v25 = vmul.f32 %v2511_v30, %v2236_v10  ;;  %v1077_v59 = vadd.f32 %v2347_v19, %v974_v18 }
 0x1bf   : > { %v1078_v0 = vadd.f32 %v2349_v36, %v975_v35  ;;  %v1079_v14 = vadd.f32 %v2351_v56, %v976_v23  ;;  %v1080_v13 = vadd.f32 %v2353_v26, %v977_v37  ;;  %v1081_v50 = vadd.f32 %v2355_v55, %v978_v3  ;;  %v2894_v3 = vld [vmem:[#allocation28_spill] sm:$0xff] }
 0x1c0   : > { %v1082_v16 = vadd.f32 %v2361_v54, %v979_v62  ;;  %v879_v20 = vmul.f32 %v2511_v30, %v2242_v22  ;;  %v880_v10 = vmul.f32 %v2511_v30, %v2245_v9  ;;  %1149 = vst [vmem:[%s2381_s30 + $0x180] sm:$0xff] %v1077_v59  ;;  %v881_v41 = vmul.f32 %v2511_v30, %v2250_v46  ;;  %v2896_v59 = vld [vmem:[#allocation19_spill] sm:$0xff] }
 0x1c1   : > { %1150 = vst [vmem:[%s2381_s30 + $0x188] sm:$0xff] %v1078_v0  ;;  %1151 = vst [vmem:[%s2381_s30 + $0x190] sm:$0xff] %v1079_v14  ;;  %v882_v45 = vmul.f32 %v2511_v30, %v2275_v43  ;;  %v980_v47 = vmul.f32 %v2335_v21, %v877_v39  ;;  %v981_v2 = vmul.f32 %v2337_v40, %v878_v25  ;;  %v796_v46 = vmul.f32 0.0013020834, %v784_v49  ;;  %v2895_v39 = vld [vmem:[#allocation29_spill] sm:$0xff]  ;;  %v2897_v14 = vld [vmem:[#allocation22_spill] sm:$0xff] }
 0x1c2   : > { %1152 = vst [vmem:[%s2381_s30 + $0x198] sm:$0xff] %v1080_v13  ;;  %1153 = vst [vmem:[%s2381_s30 + $0x1a0] sm:$0xff] %v1081_v50  ;;  %v982_v9 = vmul.f32 %v2339_v6, %v879_v20  ;;  %v983_v22 = vmul.f32 %v2341_v11, %v880_v10  ;;  %v984_v43 = vmul.f32 %v2343_v17, %v881_v41  ;;  %v2898_v49 = vld [vmem:[#allocation23_spill] sm:$0xff] }
 0x1c3   : > { %1154 = vst [vmem:[%s2381_s30 + $0x1a8] sm:$0xff] %v1082_v16  ;;  %v985_v30 = vmul.f32 %v2345_v5, %v882_v45  ;;  %v1083_v34 = vadd.f32 %v2347_v19, %v980_v47  ;;  %v1084_v15 = vadd.f32 %v2349_v36, %v981_v2  ;;  %v808_v4 = vadd.f32 1e-05, %v796_v46  ;;  %v2899_v16 = vld [vmem:[#allocation24_spill] sm:$0xff] }
 0x1c4   : > { %v1085_v27 = vadd.f32 %v2351_v56, %v982_v9  ;;  %v1086_v24 = vadd.f32 %v2353_v26, %v983_v22  ;;  %v1087_v48 = vadd.f32 %v2355_v55, %v984_v43  ;;  %v883_v63 = vmul.f32 %v1360_v58, %v2261_v42 }
 0x1c5   : > { %v1088_v28 = vadd.f32 %v2361_v54, %v985_v30  ;;  %1155 = vst [vmem:[%s2381_s30 + $0x1b0] sm:$0xff] %v1083_v34  ;;  %1156 = vst [vmem:[%s2381_s30 + $0x1b8] sm:$0xff] %v1084_v15  ;;  %1361 = vrsqrt.f32 %v808_v4  ;;  %v884_v61 = vmul.f32 %v1360_v58, %v2264_v29  ;;  %v885_v12 = vmul.f32 %v1360_v58, %v2267_v32 }
 0x1c6   : > { %1157 = vst [vmem:[%s2381_s30 + $0x1c0] sm:$0xff] %v1085_v27  ;;  %1158 = vst [vmem:[%s2381_s30 + $0x1c8] sm:$0xff] %v1086_v24  ;;  %v886_v8 = vmul.f32 %v1360_v58, %v2891_v38  ;;  %v887_v1 = vmul.f32 %v1360_v58, %v2892_v31  ;;  %v888_v44 = vmul.f32 %v1360_v58, %v2893_v53 }
 0x1c7   : > { %1159 = vst [vmem:[%s2381_s30 + $0x1d0] sm:$0xff] %v1087_v48  ;;  %1160 = vst [vmem:[%s2381_s30 + $0x1d8] sm:$0xff] %v1088_v28  ;;  %v986_v57 = vmul.f32 %v2335_v21, %v883_v63  ;;  %v987_v51 = vmul.f32 %v2337_v40, %v884_v61  ;;  %v988_v7 = vmul.f32 %v2339_v6, %v885_v12 }
 0x1c8   : > { %v989_v42 = vmul.f32 %v2341_v11, %v886_v8  ;;  %v990_v32 = vmul.f32 %v2343_v17, %v887_v1  ;;  %v991_v52 = vmul.f32 %v2345_v5, %v888_v44 }
 0x1c9   : > { %v1089_v33 = vadd.f32 %v2347_v19, %v986_v57  ;;  %v1090_v60 = vadd.f32 %v2349_v36, %v987_v51  ;;  %v1091_v18 = vadd.f32 %v2351_v56, %v988_v7 }
 0x1ca   : > { %v1092_v35 = vadd.f32 %v2353_v26, %v989_v42  ;;  %v1093_v23 = vadd.f32 %v2355_v55, %v990_v32  ;;  %v1094_v37 = vadd.f32 %v2361_v54, %v991_v52 }
 0x1cb   : > { %1161 = vst [vmem:[%s2381_s30 + $0x1e0] sm:$0xff] %v1089_v33  ;;  %1162 = vst [vmem:[%s2381_s30 + $0x1e8] sm:$0xff] %v1090_v60 }
 0x1cc   : > { %1163 = vst [vmem:[%s2381_s30 + $0x1f0] sm:$0xff] %v1091_v18  ;;  %1164 = vst [vmem:[%s2381_s30 + $0x1f8] sm:$0xff] %v1092_v35 }
 0x1cd   : > { %1165 = vst [vmem:[%s2381_s30 + $0x200] sm:$0xff] %v1093_v23  ;;  %1166 = vst [vmem:[%s2381_s30 + $0x208] sm:$0xff] %v1094_v37 }
 0x1cf   : > { %v1362_v29 = vpop.eup %1361 }
 0x1d0   : > { %v889_v62 = vmul.f32 %v1362_v29, %v2894_v3  ;;  %v890_v25 = vmul.f32 %v1362_v29, %v2895_v39  ;;  %v891_v0 = vmul.f32 %v1362_v29, %v2896_v59  ;;  %v892_v13 = vmul.f32 %v1362_v29, %v2897_v14 }
 0x1d1   : > { %v893_v50 = vmul.f32 %v1362_v29, %v2898_v49  ;;  %v894_v20 = vmul.f32 %v1362_v29, %v2899_v16 }
 0x1d2   : > { %v992_v10 = vmul.f32 %v2335_v21, %v889_v62  ;;  %v993_v41 = vmul.f32 %v2337_v40, %v890_v25  ;;  %v994_v45 = vmul.f32 %v2339_v6, %v891_v0  ;;  %v995_v47 = vmul.f32 %v2341_v11, %v892_v13 }
 0x1d3   : > { %v996_v2 = vmul.f32 %v2343_v17, %v893_v50  ;;  %v997_v9 = vmul.f32 %v2345_v5, %v894_v20 }
 0x1d4   : > { %v1095_v22 = vadd.f32 %v2347_v19, %v992_v10  ;;  %v1096_v46 = vadd.f32 %v2349_v36, %v993_v41  ;;  %v1097_v21 = vadd.f32 %v2351_v56, %v994_v45  ;;  %v1098_v40 = vadd.f32 %v2353_v26, %v995_v47 }
 0x1d5   : > { %v1099_v6 = vadd.f32 %v2355_v55, %v996_v2  ;;  %v1100_v11 = vadd.f32 %v2361_v54, %v997_v9 }
 0x1d6   : > { %1167 = vst [vmem:[%s2381_s30 + $0x210] sm:$0xff] %v1095_v22  ;;  %1168 = vst [vmem:[%s2381_s30 + $0x218] sm:$0xff] %v1096_v46 }
 0x1d7   : > { %1169 = vst [vmem:[%s2381_s30 + $0x220] sm:$0xff] %v1097_v21  ;;  %1170 = vst [vmem:[%s2381_s30 + $0x228] sm:$0xff] %v1098_v40 }
 0x1d8   : > { %1171 = vst [vmem:[%s2381_s30 + $0x230] sm:$0xff] %v1099_v6  ;;  %1172 = vst [vmem:[%s2381_s30 + $0x238] sm:$0xff] %v1100_v11 }
 0x1d9   : > { %1406 = shalt.err (!%p1403_p4)
}
 0x1da   : > { %s1407_s25 = scalar_lea.hbm %s2657_s13, 9216  ;;  %s1411_s23 = scalar_lea.hbm %s2716_s4, 36864 }
 0x1db   : > { %p1408_p5 = scmp.ne.s32.totalorder %s2657_s13, %s1407_s25  ;;  %p1412_p1 = scmp.lt.u32.totalorder %s2657_s13, %s2716_s4 }
 0x1dc   : > { %p1413_p3 = scmp.lt.u32.totalorder %s1411_s23, %s1407_s25  ;;  %p1415_p6 = scmp.lt.u32.totalorder %s1407_s25, %s2657_s13 }
 0x1dd   : > { %p1409_p7 = pnand %p1408_p5, %p2900_p11 }
 0x1de   : > { %p1414_p10 = por %p1413_p3, %p1412_p1 }
 0x1df   : > { %p1410_p13 = pneg %p1409_p7 }
 0x1e0   : > { %p1416_p12 = por %p1415_p6, %p1414_p10 }
 0x1e2   : > { %p1417_p8 = pnand %p1416_p12, %p1410_p13 }
 0x1e4   : > { %1420 = shalt.err (!%p1417_p8)
}
 0x1e5   : > { %s1465_s30 = smov 768   ;;  %s1466_s6 = smov 48  }
 0x1e6   : > { %1289 = dma.vmem_to_hbm [thread:$0]  (%p2900_p11), %s2659_s7, 9216, %s2657_s13, %s1174_s14, %s1465_s30, %s1465_s30, %s1466_s6  }
 0x1e7 PF: > { %p1302_p9 = scmp.ge.s32.totalorder %s1459_s18, 2  ;;  %s1203_s19 = sand.u32 1, %s1447_s15  }
 0x1e8   : > { %p2901_p0 = scmp.ne.s32.totalorder %s2779_s27, 0  ;;  %s1204_s9 = scalar_lea.sflag [#allocation4], %s1203_s19 }
 0x1ea   : > { %p1296_p2 = pnand %p1302_p9, %p2901_p0 }
 0x1ec   : > { %1442 = dma.done.wait (!%p1296_p2), %s1204_s9, 9216  }
 0x1ed   : > { %1444 = vsyncadd (!%p1296_p2), %s1204_s9, 4294958080  ;;  %p17_p4 = scmp.ge.s32.totalorder %s1517_s21, 6   ;;  %s2902_s15 = smov %s1451_s16 }
 0x1ee   : > { %s2903_s16 = smov %s1455_s17  ;;  %s2904_s17 = smov %s1529_s24 }
 0x1ef   : > { %s2905_s18 = smov %s1517_s21  ;;  %19 = sbr.rel (!%p17_p4) target bundleno = 5 (0x5), region = 84 }
 0x1f6   :  { %1209 = vsyncpa [#allocation3], 1 }
 0x1f7   :  { %1211 = vsyncpa [#allocation3 + $0x1], 1 }
 0x1f8   :  { %1212 = vsyncpa [#allocation4], 1 }
 0x1f9   :  { %1214 = vsyncpa [#allocation4 + $0x1], 1 }

</bundles_post_ra>
